<compile_context>
chip_gen: v7x
topology: tpu7x:2x2x1
jax: 0.10.0
libtpu: 0.0.40
codegen_flags: <defaults>
</compile_context>

<pallas_src>
import jax
import jax.numpy as jnp
from jax.experimental import pallas as pl
from jax.experimental.pallas import tpu as pltpu

EPS = 1e-5      # nn.BatchNorm2d default eps
LANE = 128      # TPU lane width


# ------------------------------ Pallas kernel -------------------------------

def _conv3x3_bn_relu(x_bf16, w_bf16):
    """3x3 valid conv (9 long-M 2-D MXU taps, f32 acc) + training-mode BN + ReLU.

    x_bf16: (N, H, W, Ci) bf16 value resident in VMEM (cast once, outside).
    w_bf16: (9, Ci, Co)   bf16 value, tap-major (index = dh*3 + dw).
    Returns ((M, Co) float32 with M = N*(H-2)*(W-2),  4-D output shape).
    """
    N, H, W, Ci = x_bf16.shape
    Co = w_bf16.shape[-1]
    Ho, Wo = H - 2, W - 2
    M = N * Ho * Wo

    acc = jnp.zeros((M, Co), jnp.float32)
    for dh in range(3):
        for dw in range(3):
            # Fused im2col: static slice of the VMEM-resident activation,
            # collapsed to a single long-M LHS so the MXU sees one stream per
            # tap and the RHS weight slice stays in the weight path.
            tap = x_bf16[:, dh:dh + Ho, dw:dw + Wo, :].reshape(M, Ci)
            acc = acc + jnp.dot(tap, w_bf16[dh * 3 + dw],
                                preferred_element_type=jnp.float32)

    # BatchNorm2d (training mode): biased per-channel statistics over the M
    # rows (== axes (N, H, W)), centered two-pass variance, gamma=1, beta=0.
    inv_m = 1.0 / float(M)
    mean = jnp.sum(acc, axis=0, keepdims=True) * inv_m
    cent = acc - mean
    var = jnp.sum(cent * cent, axis=0, keepdims=True) * inv_m
    y = jnp.maximum(cent * jax.lax.rsqrt(var + EPS), 0.0)   # BN + ReLU
    return y, (N, Ho, Wo, Co)


def _down_fused_kernel(xw_ref, w1_ref, w2_ref, o_ref):
    # xw_ref: (4*N, H/2, W/2, Cin) bf16 — the four 2x2-pool corners stacked
    # along the leading axis (corner k occupies rows [k*N, (k+1)*N)).
    N = xw_ref.shape[0] // 4
    x = xw_ref[...]

    # 1) MaxPool2d(2): elementwise max over the four window corners (bf16;
    #    rounding is monotone so this equals pooling in f32 then rounding).
    p = jnp.maximum(jnp.maximum(x[0 * N:1 * N], x[1 * N:2 * N]),
                    jnp.maximum(x[2 * N:3 * N], x[3 * N:4 * N]))

    # 2) conv3x3 + BN + ReLU, twice.  Intermediates never leave VMEM; the only
    #    casts are one per conv input (hoisted out of the tap loops).
    h1_2d, shp1 = _conv3x3_bn_relu(p, w1_ref[...])
    h1 = h1_2d.reshape(shp1).astype(jnp.bfloat16)
    h2_2d, _ = _conv3x3_bn_relu(h1, w2_ref[...])

    # 3) Lane- and sublane-dense store: flat (N*Ho*Wo, 128) f32 slab.
    o_ref[...] = h2_2d


def _vmem_spec():
    return pl.BlockSpec(memory_space=pltpu.MemorySpace.VMEM)


# ------------------------------- JAX wrapper ---------------------------------

@jax.jit
def down_forward(x_nchw, params):
    """`Down` forward pass, NCHW in / NCHW out."""
    N, C, H, W = x_nchw.shape
    assert H % 2 == 0 and W % 2 == 0, "MaxPool2d(2) requires even H and W"
    Hh, Wh = H // 2, W // 2
    assert Hh >= 5 and Wh >= 5, "two valid 3x3 convs need pooled spatial >= 5"
    Ho, Wo = Hh - 4, Wh - 4

    # Stack the four 2x2-pool corners on a leading axis with one fused XLA
    # transpose (same HBM traffic as the NCHW->NHWC transpose we need anyway),
    # and cast to bf16 once so the kernel reads half the bytes.
    xw = x_nchw.reshape(N, C, Hh, 2, Wh, 2)
    xw = jnp.transpose(xw, (3, 5, 0, 2, 4, 1)).reshape(4 * N, Hh, Wh, C)
    xw = xw.astype(jnp.bfloat16)

    # Conv weights: OIHW -> tap-major (9, Ci, Co) in bf16, matching the
    # in-kernel tap order.  Conv2's output channels are zero-padded to the
    # lane width so the kernel's only HBM store is lane-dense (padded
    # channels normalize to exactly 0 and are sliced off below).
    w1 = jnp.transpose(params["w1"], (2, 3, 1, 0)).reshape(9, C, -1)
    cmid = w1.shape[-1]
    w2 = jnp.transpose(params["w2"], (2, 3, 1, 0)).reshape(9, cmid, -1)
    cout = w2.shape[-1]
    cpad = -(-cout // LANE) * LANE
    w2 = jnp.pad(w2, ((0, 0), (0, 0), (0, cpad - cout)))
    w1 = w1.astype(jnp.bfloat16)
    w2 = w2.astype(jnp.bfloat16)
    # Conv biases (params["b1"/"b2"]) are intentionally NOT passed: with
    # training-mode BN (gamma=1, beta=0) the per-channel bias is exactly
    # cancelled by the mean subtraction.

    out2d = pl.pallas_call(
        _down_fused_kernel,
        out_shape=jax.ShapeDtypeStruct((N * Ho * Wo, cpad), jnp.float32),
        in_specs=[_vmem_spec()] * 3,
        out_specs=_vmem_spec(),
        compiler_params=pltpu.CompilerParams(
            # Scoped VMEM default is 16/32 MiB (v5e / v6e+v7x); make the budget
            # explicit so growing shapes fail loudly instead of silently
            # spilling.  Total residents here are a few tens of KiB.
            vmem_limit_bytes=32 * 1024 * 1024),
    )(xw, w1, w2)

    out = out2d.reshape(N, Ho, Wo, cpad)[..., :cout]   # drop lane padding
    return jnp.transpose(out, (0, 3, 1, 2))            # NHWC -> NCHW


# ----------------------------- parameter init -------------------------------

def init_params(key, in_channels, out_channels):
    mid = out_channels
    k1, k2, k3, k4 = jax.random.split(key, 4)

    def xavier(k, cout, cin):  # xavier_uniform_ on (cout, cin, 3, 3)
        fan_in, fan_out = cin * 9, cout * 9
        bound = (6.0 / (fan_in + fan_out)) ** 0.5
        return jax.random.uniform(k, (cout, cin, 3, 3), jnp.float32, -bound, bound)

    def bias(k, cout, cin):    # PyTorch Conv2d default bias init
        bound = 1.0 / (cin * 9) ** 0.5
        return jax.random.uniform(k, (cout,), jnp.float32, -bound, bound)

    # BN gamma=1, beta=0 (module init) => pure normalization, no affine params.
    # TODO(synk): running-stat updates (momentum=0.8) are not modeled; they do
    # not affect the training-mode forward output.
    return dict(w1=xavier(k1, mid, in_channels), b1=bias(k2, mid, in_channels),
                w2=xavier(k3, out_channels, mid), b2=bias(k4, out_channels, mid))


# ------------------------------- reference ----------------------------------

def down_reference(x_nchw, params):
    def pool(x):
        return jax.lax.reduce_window(x, -jnp.inf, jax.lax.max,
                                     (1, 1, 2, 2), (1, 1, 2, 2), "VALID")

    def conv_bn_relu(x, w, b):
        y = jax.lax.conv_general_dilated(
            x, w, (1, 1), "VALID", dimension_numbers=("NCHW", "OIHW", "NCHW"))
        y = y + b[None, :, None, None]           # bias included on purpose —
        mean = jnp.mean(y, axis=(0, 2, 3), keepdims=True)   # BN cancels it.
        var = jnp.mean((y - mean) ** 2, axis=(0, 2, 3), keepdims=True)
        y = (y - mean) / jnp.sqrt(var + EPS)
        return jnp.maximum(y, 0.0)

    h = pool(x_nchw)
    h = conv_bn_relu(h, params["w1"], params["b1"])
    h = conv_bn_relu(h, params["w2"], params["b2"])
    return h


# --------------------------------- main --------------------------------------

if __name__ == "__main__":
    key = jax.random.PRNGKey(0)
    kx, kp = jax.random.split(key)

    in_channels, out_channels = 4, 8
    x = jax.random.normal(kx, (2, in_channels, 16, 16), jnp.float32)
    params = init_params(kp, in_channels, out_channels)

    out = down_forward(x, params)
    out = jax.block_until_ready(out)

    assert out.shape == (2, out_channels, 4, 4), out.shape
    ref = down_reference(x, params)
    if not jnp.allclose(out, ref, atol=3e-2, rtol=3e-2):
        raise AssertionError(
            f"mismatch vs reference, max abs err = {jnp.max(jnp.abs(out - ref))}")
    print("KERNEL_OK")
</pallas_src>

<mosaic_0001>
module attributes {stable_mosaic.version = 11 : i64} {
  func.func @_down_fused_kernel(%arg0: memref<8x8x8x4xbf16, #tpu.memory_space<vmem>>, %arg1: memref<9x4x8xbf16, #tpu.memory_space<vmem>>, %arg2: memref<9x8x128xbf16, #tpu.memory_space<vmem>>, %arg3: memref<32x128xf32, #tpu.memory_space<vmem>>) attributes {dimension_semantics = [], scalar_prefetch = 0 : i64, scratch_operands = 0 : i64, tpu.core_type = #tpu.core_type<tc>} {
    %c0 = arith.constant 0 : index
    %c0_0 = arith.constant 0 : index
    %c0_1 = arith.constant 0 : index
    %c0_2 = arith.constant 0 : index
    %0 = vector.load %arg0[%c0, %c0_0, %c0_1, %c0_2] : memref<8x8x8x4xbf16, #tpu.memory_space<vmem>>, vector<8x8x8x4xbf16>
    %1 = vector.extract_strided_slice %0 {offsets = [0, 0, 0, 0], sizes = [2, 8, 8, 4], strides = [1, 1, 1, 1]} : vector<8x8x8x4xbf16> to vector<2x8x8x4xbf16>
    %2 = vector.extract_strided_slice %0 {offsets = [2, 0, 0, 0], sizes = [2, 8, 8, 4], strides = [1, 1, 1, 1]} : vector<8x8x8x4xbf16> to vector<2x8x8x4xbf16>
    %3 = arith.maximumf %1, %2 : vector<2x8x8x4xbf16>
    %4 = vector.extract_strided_slice %0 {offsets = [4, 0, 0, 0], sizes = [2, 8, 8, 4], strides = [1, 1, 1, 1]} : vector<8x8x8x4xbf16> to vector<2x8x8x4xbf16>
    %5 = vector.extract_strided_slice %0 {offsets = [6, 0, 0, 0], sizes = [2, 8, 8, 4], strides = [1, 1, 1, 1]} : vector<8x8x8x4xbf16> to vector<2x8x8x4xbf16>
    %6 = arith.maximumf %4, %5 : vector<2x8x8x4xbf16>
    %7 = arith.maximumf %3, %6 : vector<2x8x8x4xbf16>
    %c0_3 = arith.constant 0 : index
    %c0_4 = arith.constant 0 : index
    %c0_5 = arith.constant 0 : index
    %8 = vector.load %arg1[%c0_3, %c0_4, %c0_5] : memref<9x4x8xbf16, #tpu.memory_space<vmem>>, vector<9x4x8xbf16>
    %cst = arith.constant 0.000000e+00 : f32
    %9 = vector.broadcast %cst : f32 to vector<72x8xf32>
    %10 = vector.extract_strided_slice %7 {offsets = [0, 0, 0, 0], sizes = [2, 6, 6, 4], strides = [1, 1, 1, 1]} : vector<2x8x8x4xbf16> to vector<2x6x6x4xbf16>
    %11 = vector.shape_cast %10 : vector<2x6x6x4xbf16> to vector<72x4xbf16>
    %12 = vector.extract_strided_slice %8 {offsets = [0, 0, 0], sizes = [1, 4, 8], strides = [1, 1, 1]} : vector<9x4x8xbf16> to vector<1x4x8xbf16>
    %13 = vector.shape_cast %12 : vector<1x4x8xbf16> to vector<4x8xbf16>
    %cst_6 = arith.constant dense<0.000000e+00> : vector<72x8xf32>
    %14 = tpu.matmul %11, %13, %cst_6 {dimension_numbers = #tpu.dot_dimension_numbers<[1], [0], [0], [1], [0, 0, 1, 1], [], []>} : vector<72x4xbf16>, vector<4x8xbf16>, vector<72x8xf32> -> vector<72x8xf32>
    %15 = arith.addf %9, %14 : vector<72x8xf32>
    %16 = vector.extract_strided_slice %7 {offsets = [0, 0, 1, 0], sizes = [2, 6, 6, 4], strides = [1, 1, 1, 1]} : vector<2x8x8x4xbf16> to vector<2x6x6x4xbf16>
    %17 = vector.shape_cast %16 : vector<2x6x6x4xbf16> to vector<72x4xbf16>
    %18 = vector.extract_strided_slice %8 {offsets = [1, 0, 0], sizes = [1, 4, 8], strides = [1, 1, 1]} : vector<9x4x8xbf16> to vector<1x4x8xbf16>
    %19 = vector.shape_cast %18 : vector<1x4x8xbf16> to vector<4x8xbf16>
    %cst_7 = arith.constant dense<0.000000e+00> : vector<72x8xf32>
    %20 = tpu.matmul %17, %19, %cst_7 {dimension_numbers = #tpu.dot_dimension_numbers<[1], [0], [0], [1], [0, 0, 1, 1], [], []>} : vector<72x4xbf16>, vector<4x8xbf16>, vector<72x8xf32> -> vector<72x8xf32>
    %21 = arith.addf %15, %20 : vector<72x8xf32>
    %22 = vector.extract_strided_slice %7 {offsets = [0, 0, 2, 0], sizes = [2, 6, 6, 4], strides = [1, 1, 1, 1]} : vector<2x8x8x4xbf16> to vector<2x6x6x4xbf16>
    %23 = vector.shape_cast %22 : vector<2x6x6x4xbf16> to vector<72x4xbf16>
    %24 = vector.extract_strided_slice %8 {offsets = [2, 0, 0], sizes = [1, 4, 8], strides = [1, 1, 1]} : vector<9x4x8xbf16> to vector<1x4x8xbf16>
    %25 = vector.shape_cast %24 : vector<1x4x8xbf16> to vector<4x8xbf16>
    %cst_8 = arith.constant dense<0.000000e+00> : vector<72x8xf32>
    %26 = tpu.matmul %23, %25, %cst_8 {dimension_numbers = #tpu.dot_dimension_numbers<[1], [0], [0], [1], [0, 0, 1, 1], [], []>} : vector<72x4xbf16>, vector<4x8xbf16>, vector<72x8xf32> -> vector<72x8xf32>
    %27 = arith.addf %21, %26 : vector<72x8xf32>
    %28 = vector.extract_strided_slice %7 {offsets = [0, 1, 0, 0], sizes = [2, 6, 6, 4], strides = [1, 1, 1, 1]} : vector<2x8x8x4xbf16> to vector<2x6x6x4xbf16>
    %29 = vector.shape_cast %28 : vector<2x6x6x4xbf16> to vector<72x4xbf16>
    %30 = vector.extract_strided_slice %8 {offsets = [3, 0, 0], sizes = [1, 4, 8], strides = [1, 1, 1]} : vector<9x4x8xbf16> to vector<1x4x8xbf16>
    %31 = vector.shape_cast %30 : vector<1x4x8xbf16> to vector<4x8xbf16>
    %cst_9 = arith.constant dense<0.000000e+00> : vector<72x8xf32>
    %32 = tpu.matmul %29, %31, %cst_9 {dimension_numbers = #tpu.dot_dimension_numbers<[1], [0], [0], [1], [0, 0, 1, 1], [], []>} : vector<72x4xbf16>, vector<4x8xbf16>, vector<72x8xf32> -> vector<72x8xf32>
    %33 = arith.addf %27, %32 : vector<72x8xf32>
    %34 = vector.extract_strided_slice %7 {offsets = [0, 1, 1, 0], sizes = [2, 6, 6, 4], strides = [1, 1, 1, 1]} : vector<2x8x8x4xbf16> to vector<2x6x6x4xbf16>
    %35 = vector.shape_cast %34 : vector<2x6x6x4xbf16> to vector<72x4xbf16>
    %36 = vector.extract_strided_slice %8 {offsets = [4, 0, 0], sizes = [1, 4, 8], strides = [1, 1, 1]} : vector<9x4x8xbf16> to vector<1x4x8xbf16>
    %37 = vector.shape_cast %36 : vector<1x4x8xbf16> to vector<4x8xbf16>
    %cst_10 = arith.constant dense<0.000000e+00> : vector<72x8xf32>
    %38 = tpu.matmul %35, %37, %cst_10 {dimension_numbers = #tpu.dot_dimension_numbers<[1], [0], [0], [1], [0, 0, 1, 1], [], []>} : vector<72x4xbf16>, vector<4x8xbf16>, vector<72x8xf32> -> vector<72x8xf32>
    %39 = arith.addf %33, %38 : vector<72x8xf32>
    %40 = vector.extract_strided_slice %7 {offsets = [0, 1, 2, 0], sizes = [2, 6, 6, 4], strides = [1, 1, 1, 1]} : vector<2x8x8x4xbf16> to vector<2x6x6x4xbf16>
    %41 = vector.shape_cast %40 : vector<2x6x6x4xbf16> to vector<72x4xbf16>
    %42 = vector.extract_strided_slice %8 {offsets = [5, 0, 0], sizes = [1, 4, 8], strides = [1, 1, 1]} : vector<9x4x8xbf16> to vector<1x4x8xbf16>
    %43 = vector.shape_cast %42 : vector<1x4x8xbf16> to vector<4x8xbf16>
    %cst_11 = arith.constant dense<0.000000e+00> : vector<72x8xf32>
    %44 = tpu.matmul %41, %43, %cst_11 {dimension_numbers = #tpu.dot_dimension_numbers<[1], [0], [0], [1], [0, 0, 1, 1], [], []>} : vector<72x4xbf16>, vector<4x8xbf16>, vector<72x8xf32> -> vector<72x8xf32>
    %45 = arith.addf %39, %44 : vector<72x8xf32>
    %46 = vector.extract_strided_slice %7 {offsets = [0, 2, 0, 0], sizes = [2, 6, 6, 4], strides = [1, 1, 1, 1]} : vector<2x8x8x4xbf16> to vector<2x6x6x4xbf16>
    %47 = vector.shape_cast %46 : vector<2x6x6x4xbf16> to vector<72x4xbf16>
    %48 = vector.extract_strided_slice %8 {offsets = [6, 0, 0], sizes = [1, 4, 8], strides = [1, 1, 1]} : vector<9x4x8xbf16> to vector<1x4x8xbf16>
    %49 = vector.shape_cast %48 : vector<1x4x8xbf16> to vector<4x8xbf16>
    %cst_12 = arith.constant dense<0.000000e+00> : vector<72x8xf32>
    %50 = tpu.matmul %47, %49, %cst_12 {dimension_numbers = #tpu.dot_dimension_numbers<[1], [0], [0], [1], [0, 0, 1, 1], [], []>} : vector<72x4xbf16>, vector<4x8xbf16>, vector<72x8xf32> -> vector<72x8xf32>
    %51 = arith.addf %45, %50 : vector<72x8xf32>
    %52 = vector.extract_strided_slice %7 {offsets = [0, 2, 1, 0], sizes = [2, 6, 6, 4], strides = [1, 1, 1, 1]} : vector<2x8x8x4xbf16> to vector<2x6x6x4xbf16>
    %53 = vector.shape_cast %52 : vector<2x6x6x4xbf16> to vector<72x4xbf16>
    %54 = vector.extract_strided_slice %8 {offsets = [7, 0, 0], sizes = [1, 4, 8], strides = [1, 1, 1]} : vector<9x4x8xbf16> to vector<1x4x8xbf16>
    %55 = vector.shape_cast %54 : vector<1x4x8xbf16> to vector<4x8xbf16>
    %cst_13 = arith.constant dense<0.000000e+00> : vector<72x8xf32>
    %56 = tpu.matmul %53, %55, %cst_13 {dimension_numbers = #tpu.dot_dimension_numbers<[1], [0], [0], [1], [0, 0, 1, 1], [], []>} : vector<72x4xbf16>, vector<4x8xbf16>, vector<72x8xf32> -> vector<72x8xf32>
    %57 = arith.addf %51, %56 : vector<72x8xf32>
    %58 = vector.extract_strided_slice %7 {offsets = [0, 2, 2, 0], sizes = [2, 6, 6, 4], strides = [1, 1, 1, 1]} : vector<2x8x8x4xbf16> to vector<2x6x6x4xbf16>
    %59 = vector.shape_cast %58 : vector<2x6x6x4xbf16> to vector<72x4xbf16>
    %60 = vector.extract_strided_slice %8 {offsets = [8, 0, 0], sizes = [1, 4, 8], strides = [1, 1, 1]} : vector<9x4x8xbf16> to vector<1x4x8xbf16>
    %61 = vector.shape_cast %60 : vector<1x4x8xbf16> to vector<4x8xbf16>
    %cst_14 = arith.constant dense<0.000000e+00> : vector<72x8xf32>
    %62 = tpu.matmul %59, %61, %cst_14 {dimension_numbers = #tpu.dot_dimension_numbers<[1], [0], [0], [1], [0, 0, 1, 1], [], []>} : vector<72x4xbf16>, vector<4x8xbf16>, vector<72x8xf32> -> vector<72x8xf32>
    %63 = arith.addf %57, %62 : vector<72x8xf32>
    %cst_15 = arith.constant dense<0.000000e+00> : vector<8xf32>
    %64 = vector.multi_reduction <add>, %63, %cst_15 [0] : vector<72x8xf32> to vector<8xf32>
    %65 = vector.shape_cast %64 : vector<8xf32> to vector<1x8xf32>
    %cst_16 = arith.constant 0.013888889 : f32
    %66 = vector.broadcast %cst_16 : f32 to vector<1x8xf32>
    %67 = arith.mulf %65, %66 : vector<1x8xf32>
    %68 = vector.broadcast %67 : vector<1x8xf32> to vector<72x8xf32>
    %69 = arith.subf %63, %68 : vector<72x8xf32>
    %70 = arith.mulf %69, %69 : vector<72x8xf32>
    %cst_17 = arith.constant dense<0.000000e+00> : vector<8xf32>
    %71 = vector.multi_reduction <add>, %70, %cst_17 [0] : vector<72x8xf32> to vector<8xf32>
    %72 = vector.shape_cast %71 : vector<8xf32> to vector<1x8xf32>
    %cst_18 = arith.constant 0.013888889 : f32
    %73 = vector.broadcast %cst_18 : f32 to vector<1x8xf32>
    %74 = arith.mulf %72, %73 : vector<1x8xf32>
    %cst_19 = arith.constant 9.99999974E-6 : f32
    %75 = vector.broadcast %cst_19 : f32 to vector<1x8xf32>
    %76 = arith.addf %74, %75 : vector<1x8xf32>
    %77 = math.rsqrt %76 : vector<1x8xf32>
    %78 = vector.broadcast %77 : vector<1x8xf32> to vector<72x8xf32>
    %79 = arith.mulf %69, %78 : vector<72x8xf32>
    %cst_20 = arith.constant 0.000000e+00 : f32
    %80 = vector.broadcast %cst_20 : f32 to vector<72x8xf32>
    %81 = arith.maximumf %79, %80 : vector<72x8xf32>
    %82 = vector.shape_cast %81 : vector<72x8xf32> to vector<2x6x6x8xf32>
    %83 = arith.truncf %82 : vector<2x6x6x8xf32> to vector<2x6x6x8xbf16>
    %c0_21 = arith.constant 0 : index
    %c0_22 = arith.constant 0 : index
    %c0_23 = arith.constant 0 : index
    %84 = vector.load %arg2[%c0_21, %c0_22, %c0_23] : memref<9x8x128xbf16, #tpu.memory_space<vmem>>, vector<9x8x128xbf16>
    %cst_24 = arith.constant 0.000000e+00 : f32
    %85 = vector.broadcast %cst_24 : f32 to vector<32x128xf32>
    %86 = vector.extract_strided_slice %83 {offsets = [0, 0, 0, 0], sizes = [2, 4, 4, 8], strides = [1, 1, 1, 1]} : vector<2x6x6x8xbf16> to vector<2x4x4x8xbf16>
    %87 = vector.shape_cast %86 : vector<2x4x4x8xbf16> to vector<32x8xbf16>
    %88 = vector.extract_strided_slice %84 {offsets = [0, 0, 0], sizes = [1, 8, 128], strides = [1, 1, 1]} : vector<9x8x128xbf16> to vector<1x8x128xbf16>
    %89 = vector.shape_cast %88 : vector<1x8x128xbf16> to vector<8x128xbf16>
    %cst_25 = arith.constant dense<0.000000e+00> : vector<32x128xf32>
    %90 = tpu.matmul %87, %89, %cst_25 {dimension_numbers = #tpu.dot_dimension_numbers<[1], [0], [0], [1], [0, 0, 1, 1], [], []>} : vector<32x8xbf16>, vector<8x128xbf16>, vector<32x128xf32> -> vector<32x128xf32>
    %91 = arith.addf %85, %90 : vector<32x128xf32>
    %92 = vector.extract_strided_slice %83 {offsets = [0, 0, 1, 0], sizes = [2, 4, 4, 8], strides = [1, 1, 1, 1]} : vector<2x6x6x8xbf16> to vector<2x4x4x8xbf16>
    %93 = vector.shape_cast %92 : vector<2x4x4x8xbf16> to vector<32x8xbf16>
    %94 = vector.extract_strided_slice %84 {offsets = [1, 0, 0], sizes = [1, 8, 128], strides = [1, 1, 1]} : vector<9x8x128xbf16> to vector<1x8x128xbf16>
    %95 = vector.shape_cast %94 : vector<1x8x128xbf16> to vector<8x128xbf16>
    %cst_26 = arith.constant dense<0.000000e+00> : vector<32x128xf32>
    %96 = tpu.matmul %93, %95, %cst_26 {dimension_numbers = #tpu.dot_dimension_numbers<[1], [0], [0], [1], [0, 0, 1, 1], [], []>} : vector<32x8xbf16>, vector<8x128xbf16>, vector<32x128xf32> -> vector<32x128xf32>
    %97 = arith.addf %91, %96 : vector<32x128xf32>
    %98 = vector.extract_strided_slice %83 {offsets = [0, 0, 2, 0], sizes = [2, 4, 4, 8], strides = [1, 1, 1, 1]} : vector<2x6x6x8xbf16> to vector<2x4x4x8xbf16>
    %99 = vector.shape_cast %98 : vector<2x4x4x8xbf16> to vector<32x8xbf16>
    %100 = vector.extract_strided_slice %84 {offsets = [2, 0, 0], sizes = [1, 8, 128], strides = [1, 1, 1]} : vector<9x8x128xbf16> to vector<1x8x128xbf16>
    %101 = vector.shape_cast %100 : vector<1x8x128xbf16> to vector<8x128xbf16>
    %cst_27 = arith.constant dense<0.000000e+00> : vector<32x128xf32>
    %102 = tpu.matmul %99, %101, %cst_27 {dimension_numbers = #tpu.dot_dimension_numbers<[1], [0], [0], [1], [0, 0, 1, 1], [], []>} : vector<32x8xbf16>, vector<8x128xbf16>, vector<32x128xf32> -> vector<32x128xf32>
    %103 = arith.addf %97, %102 : vector<32x128xf32>
    %104 = vector.extract_strided_slice %83 {offsets = [0, 1, 0, 0], sizes = [2, 4, 4, 8], strides = [1, 1, 1, 1]} : vector<2x6x6x8xbf16> to vector<2x4x4x8xbf16>
    %105 = vector.shape_cast %104 : vector<2x4x4x8xbf16> to vector<32x8xbf16>
    %106 = vector.extract_strided_slice %84 {offsets = [3, 0, 0], sizes = [1, 8, 128], strides = [1, 1, 1]} : vector<9x8x128xbf16> to vector<1x8x128xbf16>
    %107 = vector.shape_cast %106 : vector<1x8x128xbf16> to vector<8x128xbf16>
    %cst_28 = arith.constant dense<0.000000e+00> : vector<32x128xf32>
    %108 = tpu.matmul %105, %107, %cst_28 {dimension_numbers = #tpu.dot_dimension_numbers<[1], [0], [0], [1], [0, 0, 1, 1], [], []>} : vector<32x8xbf16>, vector<8x128xbf16>, vector<32x128xf32> -> vector<32x128xf32>
    %109 = arith.addf %103, %108 : vector<32x128xf32>
    %110 = vector.extract_strided_slice %83 {offsets = [0, 1, 1, 0], sizes = [2, 4, 4, 8], strides = [1, 1, 1, 1]} : vector<2x6x6x8xbf16> to vector<2x4x4x8xbf16>
    %111 = vector.shape_cast %110 : vector<2x4x4x8xbf16> to vector<32x8xbf16>
    %112 = vector.extract_strided_slice %84 {offsets = [4, 0, 0], sizes = [1, 8, 128], strides = [1, 1, 1]} : vector<9x8x128xbf16> to vector<1x8x128xbf16>
    %113 = vector.shape_cast %112 : vector<1x8x128xbf16> to vector<8x128xbf16>
    %cst_29 = arith.constant dense<0.000000e+00> : vector<32x128xf32>
    %114 = tpu.matmul %111, %113, %cst_29 {dimension_numbers = #tpu.dot_dimension_numbers<[1], [0], [0], [1], [0, 0, 1, 1], [], []>} : vector<32x8xbf16>, vector<8x128xbf16>, vector<32x128xf32> -> vector<32x128xf32>
    %115 = arith.addf %109, %114 : vector<32x128xf32>
    %116 = vector.extract_strided_slice %83 {offsets = [0, 1, 2, 0], sizes = [2, 4, 4, 8], strides = [1, 1, 1, 1]} : vector<2x6x6x8xbf16> to vector<2x4x4x8xbf16>
    %117 = vector.shape_cast %116 : vector<2x4x4x8xbf16> to vector<32x8xbf16>
    %118 = vector.extract_strided_slice %84 {offsets = [5, 0, 0], sizes = [1, 8, 128], strides = [1, 1, 1]} : vector<9x8x128xbf16> to vector<1x8x128xbf16>
    %119 = vector.shape_cast %118 : vector<1x8x128xbf16> to vector<8x128xbf16>
    %cst_30 = arith.constant dense<0.000000e+00> : vector<32x128xf32>
    %120 = tpu.matmul %117, %119, %cst_30 {dimension_numbers = #tpu.dot_dimension_numbers<[1], [0], [0], [1], [0, 0, 1, 1], [], []>} : vector<32x8xbf16>, vector<8x128xbf16>, vector<32x128xf32> -> vector<32x128xf32>
    %121 = arith.addf %115, %120 : vector<32x128xf32>
    %122 = vector.extract_strided_slice %83 {offsets = [0, 2, 0, 0], sizes = [2, 4, 4, 8], strides = [1, 1, 1, 1]} : vector<2x6x6x8xbf16> to vector<2x4x4x8xbf16>
    %123 = vector.shape_cast %122 : vector<2x4x4x8xbf16> to vector<32x8xbf16>
    %124 = vector.extract_strided_slice %84 {offsets = [6, 0, 0], sizes = [1, 8, 128], strides = [1, 1, 1]} : vector<9x8x128xbf16> to vector<1x8x128xbf16>
    %125 = vector.shape_cast %124 : vector<1x8x128xbf16> to vector<8x128xbf16>
    %cst_31 = arith.constant dense<0.000000e+00> : vector<32x128xf32>
    %126 = tpu.matmul %123, %125, %cst_31 {dimension_numbers = #tpu.dot_dimension_numbers<[1], [0], [0], [1], [0, 0, 1, 1], [], []>} : vector<32x8xbf16>, vector<8x128xbf16>, vector<32x128xf32> -> vector<32x128xf32>
    %127 = arith.addf %121, %126 : vector<32x128xf32>
    %128 = vector.extract_strided_slice %83 {offsets = [0, 2, 1, 0], sizes = [2, 4, 4, 8], strides = [1, 1, 1, 1]} : vector<2x6x6x8xbf16> to vector<2x4x4x8xbf16>
    %129 = vector.shape_cast %128 : vector<2x4x4x8xbf16> to vector<32x8xbf16>
    %130 = vector.extract_strided_slice %84 {offsets = [7, 0, 0], sizes = [1, 8, 128], strides = [1, 1, 1]} : vector<9x8x128xbf16> to vector<1x8x128xbf16>
    %131 = vector.shape_cast %130 : vector<1x8x128xbf16> to vector<8x128xbf16>
    %cst_32 = arith.constant dense<0.000000e+00> : vector<32x128xf32>
    %132 = tpu.matmul %129, %131, %cst_32 {dimension_numbers = #tpu.dot_dimension_numbers<[1], [0], [0], [1], [0, 0, 1, 1], [], []>} : vector<32x8xbf16>, vector<8x128xbf16>, vector<32x128xf32> -> vector<32x128xf32>
    %133 = arith.addf %127, %132 : vector<32x128xf32>
    %134 = vector.extract_strided_slice %83 {offsets = [0, 2, 2, 0], sizes = [2, 4, 4, 8], strides = [1, 1, 1, 1]} : vector<2x6x6x8xbf16> to vector<2x4x4x8xbf16>
    %135 = vector.shape_cast %134 : vector<2x4x4x8xbf16> to vector<32x8xbf16>
    %136 = vector.extract_strided_slice %84 {offsets = [8, 0, 0], sizes = [1, 8, 128], strides = [1, 1, 1]} : vector<9x8x128xbf16> to vector<1x8x128xbf16>
    %137 = vector.shape_cast %136 : vector<1x8x128xbf16> to vector<8x128xbf16>
    %cst_33 = arith.constant dense<0.000000e+00> : vector<32x128xf32>
    %138 = tpu.matmul %135, %137, %cst_33 {dimension_numbers = #tpu.dot_dimension_numbers<[1], [0], [0], [1], [0, 0, 1, 1], [], []>} : vector<32x8xbf16>, vector<8x128xbf16>, vector<32x128xf32> -> vector<32x128xf32>
    %139 = arith.addf %133, %138 : vector<32x128xf32>
    %cst_34 = arith.constant dense<0.000000e+00> : vector<128xf32>
    %140 = vector.multi_reduction <add>, %139, %cst_34 [0] : vector<32x128xf32> to vector<128xf32>
    %141 = vector.shape_cast %140 : vector<128xf32> to vector<1x128xf32>
    %cst_35 = arith.constant 3.125000e-02 : f32
    %142 = vector.broadcast %cst_35 : f32 to vector<1x128xf32>
    %143 = arith.mulf %141, %142 : vector<1x128xf32>
    %144 = vector.broadcast %143 : vector<1x128xf32> to vector<32x128xf32>
    %145 = arith.subf %139, %144 : vector<32x128xf32>
    %146 = arith.mulf %145, %145 : vector<32x128xf32>
    %cst_36 = arith.constant dense<0.000000e+00> : vector<128xf32>
    %147 = vector.multi_reduction <add>, %146, %cst_36 [0] : vector<32x128xf32> to vector<128xf32>
    %148 = vector.shape_cast %147 : vector<128xf32> to vector<1x128xf32>
    %cst_37 = arith.constant 3.125000e-02 : f32
    %149 = vector.broadcast %cst_37 : f32 to vector<1x128xf32>
    %150 = arith.mulf %148, %149 : vector<1x128xf32>
    %cst_38 = arith.constant 9.99999974E-6 : f32
    %151 = vector.broadcast %cst_38 : f32 to vector<1x128xf32>
    %152 = arith.addf %150, %151 : vector<1x128xf32>
    %153 = math.rsqrt %152 : vector<1x128xf32>
    %154 = vector.broadcast %153 : vector<1x128xf32> to vector<32x128xf32>
    %155 = arith.mulf %145, %154 : vector<32x128xf32>
    %cst_39 = arith.constant 0.000000e+00 : f32
    %156 = vector.broadcast %cst_39 : f32 to vector<32x128xf32>
    %157 = arith.maximumf %155, %156 : vector<32x128xf32>
    %c0_40 = arith.constant 0 : index
    %c0_41 = arith.constant 0 : index
    %158 = vector.load %arg3[%c0_40, %c0_41] : memref<32x128xf32, #tpu.memory_space<vmem>>, vector<32x128xf32>
    tpu.vector_store %arg3[%c0_40, %c0_41], %157 {strides = array<i32>} : memref<32x128xf32, #tpu.memory_space<vmem>>, vector<32x128xf32>,
    return
  }
}

</mosaic_0001>

<bundles_post_ra>
// kernel: down_forward.1
= control target key start
LH: loop header
LB: loop body
LE: loop exit
PB: predicated region body
PF: predicated region fallthrough
CT: control target
= control target key end

     0   :  { %vm987_vm0 = vcmask 1041408   ;;  %v7917_v0 = vmov 0.0   ;;  %vm5770_vm1 = vmmov 0   ;;  %v5771_v4 = vmov 1966171168   ;;  %s7911_s1 = inlined_call_operand.vmem [shape: bf16[9,4,8], index: 1, kind: input, shape index: {}]   ;;  %s7912_s0 = inlined_call_operand.vmem [shape: bf16[8,8,8,4], index: 0, kind: input, shape index: {}]   ;;  %s7913_s2 = inlined_call_operand.vmem [shape: bf16[9,8,128], index: 2, kind: input, shape index: {}]   ;;  %s7914_s3 = inlined_call_operand.vmem [shape: f32[32,128], index: 3, kind: output, shape index: {}]  }
   0x1   :  { %5383 = vmatprep.subr.bf16.mxu0 %v7917_v0  ;;  %v130_v1 = vld [vmem:[%s7911_s1 + $0x6] sm:$0x3]  ;;  %5385 = vmatprep.mubr.msk.bf16.mxu0 %vm5770_vm1, %v7917_v0  ;;  %v17_v3 = vld [vmem:[%s7912_s0 + $0x8] sm:$0xf]  ;;  %v149_v5 = vunpack.c.l.s4 %v5771_v4  ;;  %v151_v6 = vlaneseq  ;;  %v18_v8 = vld [vmem:[%s7912_s0 + $0xc] sm:$0xf] }
   0x2   :  { %v16_v2 = vld [vmem:[%s7912_s0 + $0x4] sm:$0xf]  ;;  %v5806_v7 = vsel %vm987_vm0, %v130_v1, 0  ;;  %5317 = vmatprep.subr.bf16.mxu1 %v7917_v0  ;;  %5319 = vmatprep.mubr.msk.bf16.mxu1 %vm5770_vm1, %v7917_v0  ;;  %v33_v10 = vld [vmem:[%s7912_s0 + $0x48] sm:$0xf] }
   0x3   :  { %7968 = vst [vmem:[#allocation2_spill] sm:$0xff] %v5806_v7  ;;  %v32_v9 = vld [vmem:[%s7912_s0 + $0x44] sm:$0xf]  ;;  %5384 = vmatpush3.bf16.msra.mxu0 %v5806_v7  ;;  %v34_v11 = vld [vmem:[%s7912_s0 + $0x4c] sm:$0xf]  ;;  %v150_v14 = vunpack.c.0.s8 %v149_v5  ;;  %v81_v18 = vmax.bf16 %v33_v10, %v17_v3  ;;  %v5843_v23 = vshrl.u32 %v151_v6, 7 }
   0x4   :  { %v48_v12 = vld [vmem:[%s7912_s0 + $0x84] sm:$0xf]  ;;  %v80_v13 = vmax.bf16 %v32_v9, %v16_v2  ;;  %5405 = vmatprep.subr.bf16.mxu0 %v7917_v0  ;;  %v49_v15 = vld [vmem:[%s7912_s0 + $0x88] sm:$0xf]  ;;  %v50_v16 = vld [vmem:[%s7912_s0 + $0x8c] sm:$0xf]  ;;  %v82_v19 = vmax.bf16 %v34_v11, %v18_v8 }
   0x5   :  { %v64_v17 = vld [vmem:[%s7912_s0 + $0xc4] sm:$0xf]  ;;  %v65_v20 = vld [vmem:[%s7912_s0 + $0xc8] sm:$0xf]  ;;  %v66_v21 = vld [vmem:[%s7912_s0 + $0xcc] sm:$0xf]  ;;  %v5852_v29 = vsub.s32 %v150_v14, %v5843_v23 }
   0x6   :  { %v96_v22 = vmax.bf16 %v64_v17, %v48_v12  ;;  %7969 = vst [vmem:[#allocation3_spill] sm:$0xff] %v5843_v23  ;;  %v97_v24 = vmax.bf16 %v65_v20, %v49_v15  ;;  %v98_v25 = vmax.bf16 %v66_v21, %v50_v16  ;;  %v128_v26 = vld [vmem:[%s7911_s1 + $0x2] sm:$0x3]  ;;  %vm436_vm2 = vsmask.f32 256 }
   0x7   :  { %v15_v27 = vld [vmem:[%s7912_s0] sm:$0xf]  ;;  %v989_v30 = vsel %vm987_vm0, %v128_v26, 0  ;;  %vm437_vm3 = vsmask.f32 1284  ;;  %v7971_v5 = vmov 0 }
   0x8   :  { %v112_v28 = vmax.bf16 %v96_v22, %v80_v13  ;;  %v31_v31 = vld [vmem:[%s7912_s0 + $0x40] sm:$0xf]  ;;  %v113_v33 = vmax.bf16 %v97_v24, %v81_v18  ;;  %v114_v34 = vmax.bf16 %v98_v25, %v82_v19  ;;  %5318 = vmatpush3.bf16.msra.mxu1 %v989_v30  ;;  %vm439_vm4 = vsmask.f32 2312  ;;  %vm438_vm5 = vmor %vm436_vm2, %vm437_vm3  ;;  %v131_v62 = vld [vmem:[%s7911_s1 + $0x8] sm:$0x3] }
   0x9   :  { %v47_v32 = vld [vmem:[%s7912_s0 + $0x80] sm:$0xf]  ;;  %v79_v36 = vmax.bf16 %v31_v31, %v15_v27  ;;  %5339 = vmatprep.subr.bf16.mxu1 %v7917_v0  ;;  %vm441_vm6 = vsmask.f32 3340  ;;  %vm443_vm7 = vsmask.f32 4368  ;;  %vm440_vm8 = vmor %vm438_vm5, %vm439_vm4 }
   0xa   :  { %v63_v35 = vld [vmem:[%s7912_s0 + $0xc0] sm:$0xf]  ;;  %v177_v37 = vrot.slane %v112_v28, %v5852_v29  ;;  %v200_v39 = vrot.slane %v113_v33, %v5852_v29  ;;  %v223_v40 = vrot.slane %v114_v34, %v5852_v29  ;;  %vm445_vm9 = vsmask.f32 5396  ;;  %vm442_vm10 = vmor %vm440_vm8, %vm441_vm6  ;;  %v19_v34 = vld [vmem:[%s7912_s0 + $0x10] sm:$0xf] }
   0xb   :  { %v95_v38 = vmax.bf16 %v63_v35, %v47_v32  ;;  %vm444_vm11 = vmor %vm442_vm10, %vm443_vm7  ;;  %vm447_vm12 = vsmask.f32 6424  ;;  %vm449_vm15 = vsmask.f32 7452  ;;  %vm971_vm2 = vcmask 31744  }
   0xc   :  { %v178_v41 = vcombine.high %v177_v37, %v177_v37  ;;  %v5869_v42 = vrot.slane %v177_v37, %v5852_v29  ;;  %v201_v44 = vcombine.high %v200_v39, %v200_v39  ;;  %v5872_v45 = vrot.slane %v200_v39, %v5852_v29  ;;  %vm446_vm13 = vmor %vm444_vm11, %vm445_vm9  ;;  %v20_v39 = vld [vmem:[%s7912_s0 + $0x14] sm:$0xf] }
   0xd   :  { %v111_v43 = vmax.bf16 %v95_v38, %v79_v36  ;;  %v224_v46 = vcombine.high %v223_v40, %v223_v40  ;;  %v5875_v47 = vrot.slane %v223_v40, %v5852_v29  ;;  %vm448_vm14 = vmor %vm446_vm13, %vm447_vm12  ;;  %v2315_v13 = vsel %vm987_vm0, %v131_v62, 0  ;;  %v21_v40 = vld [vmem:[%s7912_s0 + $0x18] sm:$0xf] }
   0xe   :  { %v5878_v48 = vrot.slane %v178_v41, %v5852_v29  ;;  %v5882_v49 = vcombine.high %v5869_v42, %v5869_v42  ;;  %v5886_v51 = vrot.slane %v201_v44, %v5852_v29  ;;  %v5890_v52 = vcombine.high %v5872_v45, %v5872_v45  ;;  %vm5926_vm3 = vmor %vm448_vm14, %vm449_vm15  ;;  %v53_v62 = vld [vmem:[%s7912_s0 + $0x98] sm:$0xf] }
   0xf   :  { %v154_v50 = vrot.slane %v111_v43, %v5852_v29  ;;  %v5893_v53 = vrot.slane %v224_v46, %v5852_v29  ;;  %v7972_v5 = vsel %vm5926_vm3, 4294967295, %v7971_v5  ;;  %v477_v19 = vshrl.u32 %v5869_v42, 16 }
  0x10   :  { %v1740_v54 = vcombine.low %v5869_v42, %v5878_v48  ;;  %v1741_v55 = vcombine.low %v5882_v49, %v5872_v45  ;;  %v1376_v57 = vcombine.low %v5886_v51, %v5890_v52  ;;  %v5916_v1 = vcombine.high %v5878_v48, %v5878_v48  ;;  %7973 = vst [vmem:[#allocation5_spill] sm:$0xff] %v7972_v5 }
  0x11   :  { %v155_v56 = vcombine.high %v154_v50, %v154_v50  ;;  %v1742_v58 = vcombine.low %v5875_v47, %v5893_v53  ;;  %v5904_v59 = vrot.slane %v154_v50, %v5852_v29  ;;  %v482_v22 = vshll.u32 %v5878_v48, 16  ;;  %v35_v50 = vld [vmem:[%s7912_s0 + $0x50] sm:$0xf] }
  0x12   :  { %v1749_v60 = vrot.slane %v1740_v54, %v5852_v29  ;;  %v1756_v61 = vrot.slane %v1741_v55, %v5852_v29  ;;  %v5919_v2 = vrot.slane %v1376_v57, %v5852_v29  ;;  %v485_v24 = vshrl.u32 %v5878_v48, 16  ;;  %v36_v54 = vld [vmem:[%s7912_s0 + $0x54] sm:$0xf]  ;;  %v37_v55 = vld [vmem:[%s7912_s0 + $0x58] sm:$0xf] }
  0x13   :  { %v5912_v63 = vrot.slane %v155_v56, %v5852_v29  ;;  %v1763_v3 = vrot.slane %v1742_v58, %v5852_v29  ;;  %v5924_v4 = vcombine.high %v5904_v59, %v5904_v59  ;;  %v452_v6 = vshrl.u32 %v5904_v59, 16 }
  0x14   :  { %7970 = vst [vmem:[#allocation4_spill] sm:$0xff] %v5919_v2  ;;  %v1764_v8 = vcombine.low %v1749_v60, %v1756_v61  ;;  %v490_v26 = vshll.u32 %v5882_v49, 16  ;;  %v493_v27 = vshrl.u32 %v5882_v49, 16  ;;  %v498_v28 = vshll.u32 %v5916_v1, 16  ;;  %v51_v60 = vld [vmem:[%s7912_s0 + $0x90] sm:$0xf] }
  0x15   :  { %v5933_v9 = vcombine.high %v5912_v63, %v5912_v63  ;;  %v457_v10 = vshll.u32 %v5912_v63, 16  ;;  %v460_v11 = vshrl.u32 %v5912_v63, 16  ;;  %v1765_v12 = vcombine.low %v5919_v2, %v1763_v3  ;;  %v52_v61 = vld [vmem:[%s7912_s0 + $0x94] sm:$0xf] }
  0x16   :  { %v465_v14 = vshll.u32 %v5924_v4, 16  ;;  %v468_v15 = vshrl.u32 %v5924_v4, 16  ;;  %v1772_v16 = vrot.slane %v1764_v8, %v5852_v29  ;;  %v484_v31 = vsel %vm5926_vm3, %v477_v19, %v482_v22 }
  0x17   :  { %7974 = vst [vmem:[#allocation6_spill] sm:$0xff] %v5933_v9  ;;  %v459_v17 = vsel %vm5926_vm3, %v452_v6, %v457_v10  ;;  %v473_v18 = vshll.u32 %v5933_v9, 16  ;;  %v1779_v20 = vrot.slane %v1765_v12, %v5852_v29  ;;  %v502_v32 = vshrl.u32 %v5872_v45, 16  ;;  %v68_v12 = vld [vmem:[%s7912_s0 + $0xd4] sm:$0xf] }
  0x18   :  { %v467_v21 = vsel %vm5926_vm3, %v460_v11, %v465_v14  ;;  %v507_v33 = vshll.u32 %v5886_v51, 16  ;;  %v492_v35 = vsel %vm5926_vm3, %v485_v24, %v490_v26  ;;  %v500_v36 = vsel %vm5926_vm3, %v493_v27, %v498_v28  ;;  %v67_v11 = vld [vmem:[%s7912_s0 + $0xd0] sm:$0xf] }
  0x19   :  { %v475_v25 = vsel %vm5926_vm3, %v468_v15, %v473_v18  ;;  %v1780_v30 = vcombine.low %v1772_v16, %v1779_v20  ;;  %v510_v37 = vshrl.u32 %v5886_v51, 16  ;;  %v515_v38 = vshll.u32 %v5890_v52, 16 }
  0x1a   :  { %v509_v41 = vsel %vm5926_vm3, %v502_v32, %v507_v33  ;;  %v751_v43 = vcombine.low %v459_v17, %v467_v21  ;;  %v752_v44 = vcombine.low %v475_v25, %v484_v31  ;;  %v753_v46 = vcombine.low %v492_v35, %v500_v36 }
  0x1b   :  { %5386 = vmatmul.mubr.msk.bf16.vlgmr.msra.gmra.mrb[0].mxu0 %vm971_vm2, %v1780_v30  ;;  %v5989_v56 = vsel %vm5926_vm3, %v510_v37, %v515_v38  ;;  %v2079_v57 = vcombine.low %v484_v31, %v492_v35  ;;  %v2080_v58 = vcombine.low %v500_v36, %v509_v41  ;;  %v83_v15 = vmax.bf16 %v35_v50, %v19_v34 }
  0x1c   :  { %5406 = vmatpush3.bf16.msra.mxu0 %v2315_v13  ;;  %v754_v3 = vcombine.low %v509_v41, %v5989_v56  ;;  %v761_v6 = vrot.slane %v751_v43, %v5852_v29  ;;  %v768_v8 = vrot.slane %v752_v44, %v5852_v29  ;;  %v775_v10 = vrot.slane %v753_v46, %v5852_v29  ;;  %v69_v13 = vld [vmem:[%s7912_s0 + $0xd8] sm:$0xf] }
  0x1d   :  { %5389 = vmatprep.mubr.msk.bf16.mxu0 %vm5770_vm1, %v7917_v0  ;;  %v6016_v14 = vrot.slane %v2079_v57, %v5852_v29  ;;  %5427 = vmatprep.subr.bf16.mxu0 %v7917_v0  ;;  %v84_v18 = vmax.bf16 %v36_v54, %v20_v39  ;;  %v85_v19 = vmax.bf16 %v37_v55, %v21_v40  ;;  %v518_v33 = vshrl.u32 %v5890_v52, 16 }
  0x1e   :  { %v6020_v16 = vrot.slane %v754_v3, %v5852_v29  ;;  %v783_v17 = vcombine.low %v761_v6, %v768_v8  ;;  %v6023_v20 = vrot.slane %v2080_v58, %v5852_v29  ;;  %v99_v21 = vmax.bf16 %v67_v11, %v51_v60 }
  0x1f   :  { %v100_v22 = vmax.bf16 %v68_v12, %v52_v61  ;;  %v101_v24 = vmax.bf16 %v69_v13, %v53_v62  ;;  %v6029_v27 = vcombine.high %v5875_v47, %v5875_v47  ;;  %v6033_v28 = vcombine.high %v5886_v51, %v5886_v51 }
  0x20   :  { %7975 = vst [vmem:[#allocation7_spill] sm:$0xff] %v6020_v16  ;;  %v784_v25 = vcombine.low %v775_v10, %v6020_v16  ;;  %v791_v26 = vrot.slane %v783_v17, %v5852_v29  ;;  %v115_v30 = vmax.bf16 %v99_v21, %v83_v15  ;;  %v527_v36 = vshrl.u32 %v5875_v47, 16 }
  0x21   :  { %7976 = vst [vmem:[#allocation8_spill] sm:$0xff] %v6033_v28  ;;  %v116_v31 = vmax.bf16 %v100_v22, %v84_v18  ;;  %v117_v32 = vmax.bf16 %v101_v24, %v85_v19  ;;  %v523_v35 = vshll.u32 %v6033_v28, 16  ;;  %v532_v37 = vshll.u32 %v5893_v53, 16  ;;  %v75_v28 = vld [vmem:[%s7912_s0 + $0xf0] sm:$0xf] }
  0x22   :  { %v798_v34 = vrot.slane %v784_v25, %v5852_v29  ;;  %v246_v38 = vrot.slane %v115_v30, %v5852_v29  ;;  %v6047_v41 = vcombine.high %v5893_v53, %v5893_v53  ;;  %v535_v46 = vshrl.u32 %v5893_v53, 16 }
  0x23   :  { %v269_v39 = vrot.slane %v116_v31, %v5852_v29  ;;  %v6043_v40 = vrot.slane %v117_v32, %v5852_v29  ;;  %v525_v44 = vsel %vm5926_vm3, %v518_v33, %v523_v35  ;;  %v540_v50 = vshll.u32 %v6029_v27, 16 }
  0x24   :  { %7977 = vst [vmem:[#allocation9_spill] sm:$0xff] %v6047_v41  ;;  %v799_v43 = vcombine.low %v791_v26, %v798_v34  ;;  %v247_v54 = vcombine.high %v246_v38, %v246_v38  ;;  %v6054_v55 = vrot.slane %v246_v38, %v5852_v29  ;;  %v6068_v62 = vsel %vm5926_vm3, %v527_v36, %v532_v37 }
  0x25   :  { %v270_v57 = vcombine.high %v269_v39, %v269_v39  ;;  %v6057_v58 = vrot.slane %v269_v39, %v5852_v29  ;;  %v1701_v60 = vcombine.high %v6043_v40, %v6043_v40  ;;  %v6064_v61 = vrot.slane %v6043_v40, %v5852_v29 }
  0x26   :  { %5320 = vmatmul.mubr.msk.bf16.vlgmr.msra.gmra.mrb[0].mxu1 %vm971_vm2, %v799_v43  ;;  %v543_v3 = vshrl.u32 %v6029_v27, 16  ;;  %v6072_v6 = vrot.slane %v247_v54, %v5852_v29  ;;  %v6076_v8 = vcombine.high %v6054_v55, %v6054_v55  ;;  %v1781_v12 = vcombine.low %v6029_v27, %v6054_v55 }
  0x27   :  { %7978 = vst [vmem:[#allocation10_spill] sm:$0xff] %v6064_v61  ;;  %v6079_v10 = vrot.slane %v270_v57, %v5852_v29  ;;  %v6083_v11 = vcombine.high %v6057_v58, %v6057_v58  ;;  %5323 = vmatprep.mubr.msk.bf16.mxu1 %vm5770_vm1, %v7917_v0  ;;  %v542_v13 = vsel %vm5926_vm3, %v535_v46, %v540_v50  ;;  %v548_v15 = vshll.u32 %v6047_v41, 16 }
  0x28   :  { %v552_v17 = vshrl.u32 %v6054_v55, 16  ;;  %v1424_v18 = vcombine.low %v6072_v6, %v6076_v8  ;;  %v6101_v22 = vcombine.high %v6072_v6, %v6072_v6  ;;  %v1790_v24 = vrot.slane %v1781_v12, %v5852_v29 }
  0x29   :  { %v1782_v19 = vcombine.low %v6057_v58, %v6079_v10  ;;  %v1783_v21 = vcombine.low %v6083_v11, %v6064_v61  ;;  %v6106_v25 = vsel %vm5926_vm3, %v543_v3, %v548_v15  ;;  %v557_v26 = vshll.u32 %v6072_v6, 16 }
  0x2a   :  { %7979 = vst [vmem:[#allocation11_spill] sm:$0xff] %v6101_v22  ;;  %v560_v30 = vshrl.u32 %v6072_v6, 16  ;;  %v6111_v31 = vrot.slane %v1424_v18, %v5852_v29  ;;  %v565_v34 = vshll.u32 %v6076_v8, 16  ;;  %v568_v36 = vshrl.u32 %v6076_v8, 16 }
  0x2b   :  { %v1797_v32 = vrot.slane %v1782_v19, %v5852_v29  ;;  %v1804_v33 = vrot.slane %v1783_v21, %v5852_v29  ;;  %v6118_v35 = vsel %vm5926_vm3, %v552_v17, %v557_v26  ;;  %v573_v37 = vshll.u32 %v6101_v22, 16  ;;  %v43_v22 = vld [vmem:[%s7912_s0 + $0x70] sm:$0xf] }
  0x2c   :  { %7980 = vst [vmem:[#allocation12_spill] sm:$0xff] %v6111_v31  ;;  %v577_v38 = vshrl.u32 %v6057_v58, 16  ;;  %v1805_v39 = vcombine.low %v1790_v24, %v6111_v31  ;;  %v6126_v43 = vsel %vm5926_vm3, %v560_v30, %v565_v34  ;;  %v582_v46 = vshll.u32 %v6079_v10, 16  ;;  %v132_v30 = vld [vmem:[%s7911_s1 + $0xa] sm:$0x3] }
  0x2d   :  { %v1806_v40 = vcombine.low %v1797_v32, %v1804_v33  ;;  %v6131_v50 = vsel %vm5926_vm3, %v568_v36, %v573_v37  ;;  %v800_v54 = vcombine.low %v525_v44, %v6068_v62  ;;  %v801_v57 = vcombine.low %v542_v13, %v6106_v25  ;;  %v24_v37 = vld [vmem:[%s7912_s0 + $0x24] sm:$0xf]  ;;  %v41_v31 = vld [vmem:[%s7912_s0 + $0x68] sm:$0xf] }
  0x2e   :  { %v802_v3 = vcombine.low %v6118_v35, %v6126_v43  ;;  %v1813_v12 = vrot.slane %v1805_v39, %v5852_v29  ;;  %v6141_v17 = vsel %vm5926_vm3, %v577_v38, %v582_v46  ;;  %v2081_v18 = vcombine.low %v5989_v56, %v525_v44  ;;  %v23_v56 = vld [vmem:[%s7912_s0 + $0x20] sm:$0xf]  ;;  %v40_v38 = vld [vmem:[%s7912_s0 + $0x64] sm:$0xf] }
  0x2f   :  { %v1820_v15 = vrot.slane %v1806_v40, %v5852_v29  ;;  %v803_v19 = vcombine.low %v6131_v50, %v6141_v17  ;;  %v6147_v21 = vrot.slane %v800_v54, %v5852_v29  ;;  %v6150_v24 = vrot.slane %v801_v57, %v5852_v29  ;;  %v39_v44 = vld [vmem:[%s7912_s0 + $0x60] sm:$0xf]  ;;  %v72_v54 = vld [vmem:[%s7912_s0 + $0xe4] sm:$0xf] }
  0x30   :  { %v6153_v26 = vrot.slane %v802_v3, %v5852_v29  ;;  %v2082_v33 = vcombine.low %v6068_v62, %v542_v13  ;;  %v2103_v34 = vrot.slane %v2081_v18, %v5852_v29  ;;  %v2111_v36 = vcombine.low %v6016_v14, %v6023_v20  ;;  %v55_v39 = vld [vmem:[%s7912_s0 + $0xa0] sm:$0xf]  ;;  %v56_v13 = vld [vmem:[%s7912_s0 + $0xa4] sm:$0xf] }
  0x31   :  { %7981 = vst [vmem:[#allocation13_spill] sm:$0xff] %v6147_v21  ;;  %7982 = vst [vmem:[#allocation14_spill] sm:$0xff] %v6150_v24  ;;  %v1821_v32 = vcombine.low %v1813_v12, %v1820_v15  ;;  %v6178_v40 = vrot.slane %v803_v19, %v5852_v29  ;;  %v832_v62 = vcombine.low %v6147_v21, %v6150_v24  ;;  %v71_v46 = vld [vmem:[%s7912_s0 + $0xe0] sm:$0xf]  ;;  %v2586_v20 = vsel %vm987_vm0, %v132_v30, 0 }
  0x32   :  { %7983 = vst [vmem:[#allocation15_spill] sm:$0xff] %v6153_v26  ;;  %v6196_v57 = vrot.slane %v1701_v60, %v5852_v29  ;;  %v2110_v3 = vrot.slane %v2082_v33, %v5852_v29  ;;  %v87_v12 = vmax.bf16 %v39_v44, %v23_v56  ;;  %v2119_v19 = vrot.slane %v2111_v36, %v5852_v29 }
  0x33   :  { %7984 = vst [vmem:[#allocation16_spill] sm:$0xff] %v6178_v40  ;;  %5390 = vmatmul.mubr.msk.bf16.gmra.mrb[4].mxu0 %vm971_vm2, %v1821_v32  ;;  %v833_v15 = vcombine.low %v6153_v26, %v6178_v40  ;;  %v840_v18 = vrot.slane %v832_v62, %v5852_v29  ;;  %v88_v60 = vmax.bf16 %v40_v38, %v24_v37  ;;  %v585_v44 = vshrl.u32 %v6079_v10, 16 }
  0x34   :  { %5407 = vmatprep.mubr.msk.bf16.mxu0 %vm5770_vm1, %v7917_v0  ;;  %v2112_v14 = vcombine.low %v2103_v34, %v2110_v3  ;;  %v103_v23 = vmax.bf16 %v71_v46, %v55_v39  ;;  %v104_v7 = vmax.bf16 %v72_v54, %v56_v13  ;;  %v6210_v56 = vcombine.high %v6079_v10, %v6079_v10 }
  0x35   :  { %v847_v32 = vrot.slane %v833_v15, %v5852_v29  ;;  %v590_v33 = vshll.u32 %v6083_v11, 16  ;;  %v593_v30 = vshrl.u32 %v6083_v11, 16  ;;  %v2030_v39 = vshrl.u32 %v6064_v61, 16 }
  0x36   :  { %7985 = vst [vmem:[#allocation17_spill] sm:$0xff] %v6210_v56  ;;  %v2126_v62 = vrot.slane %v2112_v14, %v5852_v29  ;;  %v119_v0 = vmax.bf16 %v103_v23, %v87_v12  ;;  %v120_v36 = vmax.bf16 %v104_v7, %v88_v60  ;;  %v598_v38 = vshll.u32 %v6210_v56, 16  ;;  %v127_v7 = vld [vmem:[%s7911_s1] sm:$0x3] }
  0x37   :  { %v848_v34 = vcombine.low %v840_v18, %v847_v32  ;;  %v6218_v37 = vsel %vm5926_vm3, %v585_v44, %v590_v33  ;;  %v2035_v14 = vshll.u32 %v6196_v57, 16  ;;  %v2128_v3 = vcombine.low %v6106_v25, %v6118_v35 }
  0x38   :  { %v2127_v13 = vcombine.low %v2119_v19, %v2126_v62  ;;  %v292_v46 = vrot.slane %v119_v0, %v5852_v29  ;;  %v315_v54 = vrot.slane %v120_v36, %v5852_v29  ;;  %v600_v23 = vsel %vm5926_vm3, %v593_v30, %v598_v38 }
  0x39   :  { %5324 = vmatmul.mubr.msk.bf16.gmra.mrb[4].mxu1 %vm971_vm2, %v848_v34  ;;  %v2129_v12 = vcombine.low %v6126_v43, %v6131_v50  ;;  %v2130_v0 = vcombine.low %v6141_v17, %v6218_v37  ;;  %v7986_v15 = vmov 0.0   ;;  %v849_v35 = vcombine.low %v6218_v37, %v600_v23 }
  0x3a   :  { %5327 = vmatprep.mubr.msk.bf16.mxu1 %vm5770_vm1, %v7986_v15  ;;  %v293_v18 = vcombine.high %v292_v46, %v292_v46  ;;  %v6241_v19 = vrot.slane %v292_v46, %v5852_v29  ;;  %v316_v60 = vcombine.high %v315_v54, %v315_v54  ;;  %v6245_v25 = vrot.slane %v315_v54, %v5852_v29 }
  0x3b   :  { %5408 = vmatmul.mubr.msk.bf16.vlgmr.msra.gmra.mrb[0].mxu0 %vm971_vm2, %v2127_v13  ;;  %v6252_v43 = vsel %vm5926_vm3, %v2030_v39, %v2035_v14  ;;  %v1299_v50 = vsel %vm987_vm0, %v127_v7, 0  ;;  %v6273_v30 = vrot.slane %v849_v35, %v5852_v29  ;;  %vm3968_vm4 = vsmask.f32 1280 }
  0x3c   :  { %5428 = vmatpush3.bf16.msra.mxu0 %v2586_v20  ;;  %5411 = vmatprep.mubr.msk.bf16.mxu0 %vm5770_vm1, %v7986_v15  ;;  %7987 = vst [vmem:[#allocation18_spill] sm:$0xff] %v6252_v43  ;;  %v6256_v17 = vrot.slane %v293_v18, %v5852_v29  ;;  %v6260_v20 = vcombine.high %v6241_v19, %v6241_v19  ;;  %v602_v33 = vshrl.u32 %v6241_v19, 16  ;;  %v627_v36 = vshrl.u32 %v6245_v25, 16 }
  0x3d   :  { %v6263_v44 = vrot.slane %v316_v60, %v5852_v29  ;;  %5340 = vmatpush3.bf16.msra.mxu1 %v1299_v50  ;;  %5449 = vmatprep.subr.bf16.mxu0 %v7986_v15  ;;  %v6269_v62 = vcombine.high %v6245_v25, %v6245_v25  ;;  %7989 = vst [vmem:[#allocation20_spill] sm:$0xff] %v6273_v30  ;;  %v25_v50 = vld [vmem:[%s7912_s0 + $0x28] sm:$0xf]  ;;  %vm3969_vm5 = vsmask.f32 3336  ;;  %vm4272_vm10 = vcmask 1040384  }
  0x3e   :  { %v2131_v34 = vcombine.low %v600_v23, %v6252_v43  ;;  %5361 = vmatprep.subr.bf16.mxu1 %v7986_v15  ;;  %v6279_v37 = vcombine.high %v6256_v17, %v6256_v17  ;;  %v607_v39 = vshll.u32 %v6256_v17, 16  ;;  %v610_v13 = vshrl.u32 %v6256_v17, 16  ;;  %vm3970_vm8 = vmor %vm3968_vm4, %vm3969_vm5 }
  0x3f   :  { %7988 = vst [vmem:[#allocation19_spill] sm:$0xff] %v6263_v44  ;;  %v6283_v38 = vcombine.high %v6263_v44, %v6263_v44  ;;  %v615_v46 = vshll.u32 %v6260_v20, 16  ;;  %v618_v54 = vshrl.u32 %v6260_v20, 16  ;;  %v632_v14 = vshll.u32 %v6263_v44, 16 }
  0x40   :  { %7990 = vst [vmem:[#allocation21_spill] sm:$0xff] %v6279_v37  ;;  %v635_v7 = vshrl.u32 %v6263_v44, 16  ;;  %v609_v23 = vsel %vm5926_vm3, %v602_v33, %v607_v39  ;;  %v623_v18 = vshll.u32 %v6279_v37, 16  ;;  %v640_v60 = vshll.u32 %v6269_v62, 16  ;;  %v26_v39 = vld [vmem:[%s7912_s0 + $0x2c] sm:$0xf] }
  0x41   :  { %7991 = vst [vmem:[#allocation22_spill] sm:$0xff] %v6283_v38  ;;  %v643_v35 = vshrl.u32 %v6269_v62, 16  ;;  %v617_v32 = vsel %vm5926_vm3, %v610_v13, %v615_v46  ;;  %v6303_v40 = vsel %vm5926_vm3, %v627_v36, %v632_v14  ;;  %v648_v43 = vshll.u32 %v6283_v38, 16  ;;  %v42_v14 = vld [vmem:[%s7912_s0 + $0x6c] sm:$0xf] }
  0x42   :  { %v2138_v33 = vrot.slane %v2128_v3, %v5852_v29  ;;  %v625_v37 = vsel %vm5926_vm3, %v618_v54, %v623_v18  ;;  %v6317_v13 = vsel %vm5926_vm3, %v635_v7, %v640_v60  ;;  %v850_v36 = vcombine.low %v609_v23, %v617_v32  ;;  %v27_v3 = vld [vmem:[%s7912_s0 + $0x30] sm:$0xf]  ;;  %v57_v23 = vld [vmem:[%s7912_s0 + $0xa8] sm:$0xf]  ;;  %v58_v18 = vld [vmem:[%s7912_s0 + $0xac] sm:$0xf] }
  0x43   :  { %v2145_v46 = vrot.slane %v2129_v12, %v5852_v29  ;;  %v6331_v54 = vsel %vm5926_vm3, %v643_v35, %v648_v43  ;;  %v851_v32 = vcombine.low %v625_v37, %v6303_v40  ;;  %v2152_v12 = vrot.slane %v2130_v0, %v5852_v29  ;;  %v73_v60 = vld [vmem:[%s7912_s0 + $0xe8] sm:$0xf]  ;;  %v74_v35 = vld [vmem:[%s7912_s0 + $0xec] sm:$0xf] }
  0x44   :  { %v2159_v7 = vrot.slane %v2131_v34, %v5852_v29  ;;  %v852_v43 = vcombine.low %v6317_v13, %v6331_v54  ;;  %v866_v37 = vrot.slane %v850_v36, %v5852_v29  ;;  %v59_v34 = vld [vmem:[%s7912_s0 + $0xb0] sm:$0xf]  ;;  %v89_v26 = vmax.bf16 %v41_v31, %v25_v50 }
  0x45   :  { %v2160_v0 = vcombine.low %v2138_v33, %v2145_v46  ;;  %v873_v24 = vrot.slane %v851_v32, %v5852_v29  ;;  %v90_v16 = vmax.bf16 %v42_v14, %v26_v39  ;;  %v91_v2 = vmax.bf16 %v43_v22, %v27_v3 }
  0x46   :  { %v2161_v21 = vcombine.low %v2152_v12, %v2159_v7  ;;  %v880_v33 = vrot.slane %v852_v43, %v5852_v29  ;;  %v881_v36 = vcombine.low %v6273_v30, %v866_v37  ;;  %v105_v9 = vmax.bf16 %v73_v60, %v57_v23 }
  0x47   :  { %v2168_v46 = vrot.slane %v2160_v0, %v5852_v29  ;;  %v106_v56 = vmax.bf16 %v74_v35, %v58_v18  ;;  %v107_v41 = vmax.bf16 %v75_v28, %v59_v34  ;;  %v6364_v44 = vcombine.high %v6064_v61, %v6064_v61 }
  0x48   :  { %v2175_v38 = vrot.slane %v2161_v21, %v5852_v29  ;;  %v882_v31 = vcombine.low %v873_v24, %v880_v33  ;;  %v889_v50 = vrot.slane %v881_v36, %v5852_v29  ;;  %v121_v39 = vmax.bf16 %v105_v9, %v89_v26 }
  0x49   :  { %7992 = vst [vmem:[#allocation23_spill] sm:$0xff] %v6364_v44  ;;  %v6369_v22 = vcombine.high %v6196_v57, %v6196_v57  ;;  %v122_v14 = vmax.bf16 %v106_v56, %v90_v16  ;;  %v123_v32 = vmax.bf16 %v107_v41, %v91_v2  ;;  %v2043_v12 = vshll.u32 %v6364_v44, 16 }
  0x4a   :  { %v2176_v3 = vcombine.low %v2168_v46, %v2175_v38  ;;  %v896_v21 = vrot.slane %v882_v31, %v5852_v29  ;;  %v338_v28 = vrot.slane %v121_v39, %v5852_v29  ;;  %v2046_v7 = vshrl.u32 %v6364_v44, 16 }
  0x4b   :  { %7993 = vst [vmem:[#allocation24_spill] sm:$0xff] %v6369_v22  ;;  %v2051_v24 = vshll.u32 %v6369_v22, 16  ;;  %v361_v9 = vrot.slane %v122_v14, %v5852_v29  ;;  %v384_v26 = vrot.slane %v123_v32, %v5852_v29  ;;  %v7994_v38 = vshrl.u32 %v6196_v57, 16 }
  0x4c   :  { %5412 = vmatmul.mubr.msk.bf16.gmra.mrb[4].mxu0 %vm971_vm2, %v2176_v3  ;;  %v2178_v16 = vcombine.low %v6303_v40, %v6317_v13  ;;  %v897_v41 = vcombine.low %v889_v50, %v896_v21  ;;  %v339_v56 = vcombine.high %v338_v28, %v338_v28  ;;  %v6388_v23 = vrot.slane %v338_v28, %v5852_v29 }
  0x4d   :  { %v6383_v2 = vsel %vm5926_vm3, %v7994_v38, %v2043_v12  ;;  %5415 = vmatprep.mubr.msk.bf16.mxu0 %vm5770_vm1, %v7986_v15  ;;  %v6394_v18 = vsel %vm5926_vm3, %v2046_v7, %v2051_v24  ;;  %v362_v60 = vcombine.high %v361_v9, %v361_v9  ;;  %v6397_v43 = vrot.slane %v361_v9, %v5852_v29 }
  0x4e   :  { %7995 = vst [vmem:[#allocation25_spill] sm:$0xff] %v6383_v2  ;;  %7996 = vst [vmem:[#allocation26_spill] sm:$0xff] %v6394_v18  ;;  %v385_v37 = vcombine.high %v384_v26, %v384_v26  ;;  %v6400_v0 = vrot.slane %v384_v26, %v5852_v29  ;;  %5328 = vmatmul.mubr.msk.bf16.gmra.mrb[8].mxu1 %vm971_vm2, %v897_v41  ;;  %v6404_v40 = vrot.slane %v339_v56, %v5852_v29  ;;  %vm3971_vm6 = vsmask.f32 5392 }
  0x4f   :  { %7997 = vst [vmem:[#allocation27_spill] sm:$0xff] %v6397_v43  ;;  %v6408_v13 = vcombine.high %v6388_v23, %v6388_v23  ;;  %v652_v34 = vshrl.u32 %v6388_v23, 16  ;;  %v2177_v35 = vcombine.low %v6383_v2, %v6394_v18  ;;  %5331 = vmatprep.mubr.msk.bf16.mxu1 %vm5770_vm1, %v7986_v15  ;;  %v6416_v33 = vrot.slane %v362_v60, %v5852_v29  ;;  %v28_v18 = vld [vmem:[%s7912_s0 + $0x34] sm:$0xf]  ;;  %vm7531_vm9 = vmor %vm3970_vm8, %vm3971_vm6 }
  0x50   :  { %7998 = vst [vmem:[#allocation28_spill] sm:$0xff] %v6400_v0  ;;  %v6420_v36 = vcombine.high %v6397_v43, %v6397_v43  ;;  %v6423_v46 = vrot.slane %v385_v37, %v5852_v29  ;;  %v6427_v31 = vcombine.high %v6400_v0, %v6400_v0  ;;  %v6431_v50 = vcombine.high %v6404_v40, %v6404_v40 }
  0x51   :  { %v657_v39 = vshll.u32 %v6404_v40, 16  ;;  %v660_v3 = vshrl.u32 %v6404_v40, 16  ;;  %v665_v14 = vshll.u32 %v6408_v13, 16  ;;  %v6438_v32 = vcombine.high %v6416_v33, %v6416_v33 }
  0x52   :  { %7999 = vst [vmem:[#allocation29_spill] sm:$0xff] %v6420_v36  ;;  %8000 = vst [vmem:[#allocation30_spill] sm:$0xff] %v6431_v50  ;;  %v668_v12 = vshrl.u32 %v6408_v13, 16  ;;  %v677_v21 = vshrl.u32 %v6397_v43, 16  ;;  %v682_v28 = vshll.u32 %v6416_v33, 16  ;;  %v673_v9 = vshll.u32 %v6431_v50, 16 }
  0x53   :  { %8001 = vst [vmem:[#allocation31_spill] sm:$0xff] %v6438_v32  ;;  %v659_v7 = vsel %vm5926_vm3, %v652_v34, %v657_v39  ;;  %v667_v24 = vsel %vm5926_vm3, %v660_v3, %v665_v14  ;;  %v685_v26 = vshrl.u32 %v6416_v33, 16  ;;  %v690_v41 = vshll.u32 %v6420_v36, 16 }
  0x54   :  { %v684_v38 = vsel %vm5926_vm3, %v677_v21, %v682_v28  ;;  %v693_v56 = vshrl.u32 %v6420_v36, 16  ;;  %v698_v60 = vshll.u32 %v6438_v32, 16  ;;  %v675_v37 = vsel %vm5926_vm3, %v668_v12, %v673_v9 }
  0x55   :  { %v702_v34 = vshrl.u32 %v6400_v0, 16  ;;  %v707_v39 = vshll.u32 %v6423_v46, 16  ;;  %v710_v3 = vshrl.u32 %v6423_v46, 16  ;;  %v692_v14 = vsel %vm5926_vm3, %v685_v26, %v690_v41  ;;  %v44_v26 = vld [vmem:[%s7912_s0 + $0x74] sm:$0xf] }
  0x56   :  { %v700_v21 = vsel %vm5926_vm3, %v693_v56, %v698_v60  ;;  %v715_v28 = vshll.u32 %v6427_v31, 16  ;;  %v898_v30 = vcombine.low %v659_v7, %v667_v24  ;;  %v899_v9 = vcombine.low %v675_v37, %v684_v38  ;;  %v60_v41 = vld [vmem:[%s7912_s0 + $0xb4] sm:$0xf] }
  0x57   :  { %v709_v12 = vsel %vm5926_vm3, %v702_v34, %v707_v39  ;;  %v900_v2 = vcombine.low %v692_v14, %v700_v21  ;;  %v2179_v22 = vcombine.low %v6331_v54, %v659_v7  ;;  %v76_v56 = vld [vmem:[%s7912_s0 + $0xf4] sm:$0xf]  ;;  %v2180_v39 = vcombine.low %v667_v24, %v675_v37 }
  0x58   :  { %v717_v60 = vsel %vm5926_vm3, %v710_v3, %v715_v28  ;;  %v6482_v34 = vrot.slane %v898_v30, %v5852_v29  ;;  %v2187_v54 = vrot.slane %v2177_v35, %v5852_v29  ;;  %v6486_v44 = vrot.slane %v899_v9, %v5852_v29 }
  0x59   :  { %v901_v7 = vcombine.low %v709_v12, %v717_v60  ;;  %v6489_v50 = vrot.slane %v900_v2, %v5852_v29  ;;  %v2194_v32 = vrot.slane %v2178_v16, %v5852_v29  ;;  %v2201_v61 = vrot.slane %v2179_v22, %v5852_v29 }
  0x5a   :  { %8002 = vst [vmem:[#allocation32_spill] sm:$0xff] %v6482_v34  ;;  %8003 = vst [vmem:[#allocation33_spill] sm:$0xff] %v6486_v44  ;;  %v2208_v0 = vrot.slane %v2180_v39, %v5852_v29  ;;  %v92_v3 = vmax.bf16 %v44_v26, %v28_v18  ;;  %v108_v28 = vmax.bf16 %v76_v56, %v60_v41  ;;  %v718_v16 = vshrl.u32 %v6427_v31, 16 }
  0x5b   :  { %8004 = vst [vmem:[#allocation34_spill] sm:$0xff] %v6489_v50  ;;  %v6495_v30 = vrot.slane %v901_v7, %v5852_v29  ;;  %v930_v35 = vcombine.low %v6482_v34, %v6486_v44  ;;  %v2209_v24 = vcombine.low %v2187_v54, %v2194_v32  ;;  %v6501_v37 = vcombine.high %v6423_v46, %v6423_v46 }
  0x5c   :  { %v2210_v2 = vcombine.low %v2201_v61, %v2208_v0  ;;  %v124_v9 = vmax.bf16 %v108_v28, %v92_v3  ;;  %v2226_v22 = vcombine.low %v684_v38, %v692_v14  ;;  %v2227_v54 = vcombine.low %v700_v21, %v709_v12 }
  0x5d   :  { %8005 = vst [vmem:[#allocation35_spill] sm:$0xff] %v6495_v30  ;;  %8006 = vst [vmem:[#allocation36_spill] sm:$0xff] %v6501_v37  ;;  %v931_v18 = vcombine.low %v6489_v50, %v6495_v30  ;;  %v938_v26 = vrot.slane %v930_v35, %v5852_v29  ;;  %v2217_v41 = vrot.slane %v2209_v24, %v5852_v29  ;;  %v723_v56 = vshll.u32 %v6501_v37, 16 }
  0x5e   :  { %v2224_v32 = vrot.slane %v2210_v2, %v5852_v29  ;;  %v407_v39 = vrot.slane %v124_v9, %v5852_v29  ;;  %v2236_v35 = vrot.slane %v2226_v22, %v5852_v29  ;;  %v2243_v24 = vrot.slane %v2227_v54, %v5852_v29 }
  0x5f   :  { %v945_v61 = vrot.slane %v931_v18, %v5852_v29  ;;  %v725_v0 = vsel %vm5926_vm3, %v718_v16, %v723_v56  ;;  %v1063_v9 = vcombine.low %v5904_v59, %v5912_v63  ;;  %v1065_v16 = vcombine.low %v5878_v48, %v5882_v49  ;;  %v29_v18 = vld [vmem:[%s7912_s0 + $0x38] sm:$0xf] }
  0x60   :  { %v2225_v38 = vcombine.low %v2217_v41, %v2224_v32  ;;  %v408_v14 = vcombine.high %v407_v39, %v407_v39  ;;  %v6515_v7 = vrot.slane %v407_v39, %v5852_v29  ;;  %v2228_v28 = vcombine.low %v717_v60, %v725_v0  ;;  %v45_v56 = vld [vmem:[%s7912_s0 + $0x78] sm:$0xf] }
  0x61   :  { %v946_v3 = vcombine.low %v938_v26, %v945_v61  ;;  %v1064_v60 = vcombine.low %v5924_v4, %v5869_v42  ;;  %v1066_v22 = vcombine.low %v5872_v45, %v5886_v51  ;;  %v2258_v54 = vcombine.low %v2236_v35, %v2243_v24  ;;  %v61_v61 = vld [vmem:[%s7912_s0 + $0xb8] sm:$0xf] }
  0x62   :  { %5416 = vmatmul.mubr.msk.bf16.gmra.mrb[8].mxu0 %vm971_vm2, %v2225_v38  ;;  %v6521_v21 = vrot.slane %v408_v14, %v5852_v29  ;;  %v6525_v12 = vcombine.high %v6515_v7, %v6515_v7  ;;  %v727_v2 = vshrl.u32 %v6515_v7, 16  ;;  %v2250_v39 = vrot.slane %v2228_v28, %v5852_v29  ;;  %v77_v38 = vld [vmem:[%s7912_s0 + $0xf8] sm:$0xf] }
  0x63   :  { %5332 = vmatmul.mubr.msk.bf16.gmra.mrb[12].mxu1 %vm971_vm2, %v946_v3  ;;  %5419 = vmatprep.mubr.msk.bf16.mxu0 %vm5770_vm1, %v7986_v15  ;;  %v1073_v50 = vrot.slane %v1063_v9, %v5852_v29  ;;  %v1080_v24 = vrot.slane %v1064_v60, %v5852_v29  ;;  %v93_v34 = vmax.bf16 %v45_v56, %v29_v18  ;;  %vm3973_vm7 = vsmask.f32 7448 }
  0x64   :  { %5335 = vmatprep.mubr.msk.bf16.mxu1 %vm5770_vm1, %v7986_v15  ;;  %v6546_v59 = vcombine.high %v6521_v21, %v6521_v21  ;;  %v732_v26 = vshll.u32 %v6521_v21, 16  ;;  %v735_v41 = vshrl.u32 %v6521_v21, 16  ;;  %v740_v49 = vshll.u32 %v6525_v12, 16  ;;  %vm7543_vm12 = vmor %vm7531_vm9, %vm3973_vm7 }
  0x65   :  { %v743_v32 = vshrl.u32 %v6525_v12, 16  ;;  %v6572_v37 = vrot.slane %v1065_v16, %v5852_v29  ;;  %v1112_v9 = vcombine.low %v5890_v52, %v5875_v47  ;;  %v1114_v16 = vcombine.low %v6054_v55, %v6072_v6 }
  0x66   :  { %v734_v14 = vsel %vm5926_vm3, %v727_v2, %v732_v26  ;;  %v742_v3 = vsel %vm5926_vm3, %v735_v41, %v740_v49  ;;  %v748_v44 = vshll.u32 %v6546_v59, 16  ;;  %v6575_v2 = vrot.slane %v1066_v22, %v5852_v29 }
  0x67   :  { %v947_v28 = vcombine.low %v725_v0, %v734_v14  ;;  %v2229_v35 = vcombine.low %v734_v14, %v742_v3  ;;  %v109_v26 = vmax.bf16 %v77_v38, %v61_v61  ;;  %v2266_v56 = vrot.slane %v2258_v54, %v5852_v29 }
  0x68   :  { %v750_v30 = vsel %vm5926_vm3, %v743_v32, %v748_v44  ;;  %v1113_v44 = vcombine.low %v5893_v53, %v6029_v27  ;;  %v1115_v32 = vcombine.low %v6076_v8, %v6057_v58  ;;  %v1095_v61 = vcombine.low %v1073_v50, %v1080_v24 }
  0x69   :  { %v948_v41 = vcombine.low %v742_v3, %v750_v30  ;;  %v6578_v49 = vrot.slane %v947_v28, %v5852_v29  ;;  %v2257_v0 = vrot.slane %v2229_v35, %v5852_v29  ;;  %v125_v60 = vmax.bf16 %v109_v26, %v93_v34 }
  0x6a   :  { %v1096_v34 = vcombine.low %v6572_v37, %v6575_v2  ;;  %v6600_v14 = vrot.slane %v1112_v9, %v5852_v29  ;;  %v6606_v8 = vrot.slane %v1113_v44, %v5852_v29  ;;  %v6609_v50 = vrot.slane %v1114_v16, %v5852_v29 }
  0x6b   :  { %8007 = vst [vmem:[#allocation37_spill] sm:$0xff] %v6578_v49  ;;  %v6588_v22 = vrot.slane %v948_v41, %v5852_v29  ;;  %v2259_v18 = vcombine.low %v2250_v39, %v2257_v0  ;;  %v1723_v38 = vrot.slane %v125_v60, %v5852_v29  ;;  %v6613_v35 = vrot.slane %v1115_v32, %v5852_v29 }
  0x6c   :  { %v5162_v24 = vcombine.high %v5872_v45, %v5886_v51  ;;  %v2398_v26 = vcombine.low %v5916_v1, %v5886_v51  ;;  %v1103_v60 = vrot.slane %v1095_v61, %v5852_v29  ;;  %v1110_v45 = vrot.slane %v1096_v34, %v5852_v29 }
  0x6d   :  { %8008 = vst [vmem:[#allocation38_spill] sm:$0xff] %v6588_v22  ;;  %v963_v52 = vcombine.low %v6578_v49, %v6588_v22  ;;  %v2273_v27 = vrot.slane %v2259_v18, %v5852_v29  ;;  %v1724_v39 = vcombine.high %v1723_v38, %v1723_v38  ;;  %v6603_v54 = vrot.slane %v1723_v38, %v5852_v29 }
  0x6e   :  { %v1145_v32 = vcombine.low %v6609_v50, %v6613_v35  ;;  %v2413_v61 = vrot.slane %v5162_v24, %v5852_v29  ;;  %v2406_v34 = vrot.slane %v2398_v26, %v5852_v29  ;;  %v1162_v24 = vcombine.low %v6241_v19, %v6256_v17 }
  0x6f   :  { %v970_v3 = vrot.slane %v963_v52, %v5852_v29  ;;  %v2274_v28 = vcombine.low %v2266_v56, %v2273_v27  ;;  %v6620_v41 = vrot.slane %v1724_v39, %v5852_v29  ;;  %v6624_v0 = vcombine.high %v6603_v54, %v6603_v54 }
  0x70   :  { %v2055_v9 = vshrl.u32 %v6603_v54, 16  ;;  %v1144_v56 = vcombine.low %v6600_v14, %v6606_v8  ;;  %v1111_v39 = vcombine.low %v1103_v60, %v1110_v45  ;;  %v1163_v26 = vcombine.low %v6260_v20, %v6245_v25  ;;  %v8013_v60 = vld [vmem:[#allocation19_spill] sm:$0xff] }
  0x71   :  { %5336 = vmatmul.mubr.msk.bf16.gmra.mrb[16].mxu1 %vm971_vm2, %v970_v3  ;;  %5420 = vmatmul.mubr.msk.bf16.gmra.mrb[12].mxu0 %vm971_vm2, %v2274_v28  ;;  %v6637_v51 = vcombine.high %v6620_v41, %v6620_v41  ;;  %v2060_v1 = vshll.u32 %v6620_v41, 16  ;;  %v2063_v44 = vshrl.u32 %v6620_v41, 16  ;;  %v2068_v16 = vshll.u32 %v6624_v0, 16 }
  0x72   :  { %5341 = vmatprep.mubr.msk.bf16.mxu1 %vm5770_vm1, %v7986_v15  ;;  %5423 = vmatprep.mubr.msk.bf16.mxu0 %vm5770_vm1, %v7986_v15  ;;  %v2071_v18 = vshrl.u32 %v6624_v0, 16  ;;  %v1161_v28 = vcombine.low %v6079_v10, %v6083_v11  ;;  %v1152_v19 = vrot.slane %v1144_v56, %v5852_v29  ;;  %v1259_v49 = vcombine.low %v6427_v31, %v6515_v7 }
  0x73   :  { %8009 = vst [vmem:[#allocation39_spill] sm:$0xff] %v6637_v51  ;;  %v6650_v38 = vsel %vm5926_vm3, %v2055_v9, %v2060_v1  ;;  %v6654_v52 = vsel %vm5926_vm3, %v2063_v44, %v2068_v16  ;;  %v2076_v27 = vshll.u32 %v6637_v51, 16  ;;  %v129_v9 = vld [vmem:[%s7911_s1 + $0x4] sm:$0x3]  ;;  %v1159_v44 = vrot.slane %v1145_v32, %v5852_v29 }
  0x74   :  { %8010 = vst [vmem:[#allocation40_spill] sm:$0xff] %v6650_v38  ;;  %8011 = vst [vmem:[#allocation41_spill] sm:$0xff] %v6654_v52  ;;  %v2275_v3 = vcombine.low %v750_v30, %v6650_v38  ;;  %v1164_v30 = vcombine.low %v8013_v60, %v6269_v62  ;;  %v2415_v16 = vcombine.low %v2413_v61, %v6606_v8  ;;  %v1609_v51 = vsel %vm987_vm0, %v129_v9, 0 }
  0x75   :  { %v6668_v1 = vsel %vm5926_vm3, %v2071_v18, %v2076_v27  ;;  %v2414_v18 = vcombine.low %v6572_v37, %v2406_v34  ;;  %v6682_v27 = vrot.slane %v1161_v28, %v5852_v29  ;;  %v8014_v37 = vld [vmem:[#allocation9_spill] sm:$0xff]  ;;  %v5163_v61 = vcombine.high %v6054_v55, %v6072_v6 }
  0x76   :  { %8012 = vst [vmem:[#allocation42_spill] sm:$0xff] %v6668_v1  ;;  %v2276_v11 = vcombine.low %v6654_v52, %v6668_v1  ;;  %v2283_v45 = vrot.slane %v2275_v3, %v5852_v29  ;;  %v1178_v1 = vrot.slane %v1162_v24, %v5852_v29  ;;  %v1185_v3 = vrot.slane %v1163_v26, %v5852_v29  ;;  %v8015_v34 = vld [vmem:[#allocation17_spill] sm:$0xff] }
  0x77   :  { %v6690_v56 = vrot.slane %v1164_v30, %v5852_v29  ;;  %v2431_v32 = vcombine.low %v8014_v37, %v6072_v6  ;;  %v1160_v9 = vcombine.low %v1152_v19, %v1159_v44  ;;  %v1210_v24 = vcombine.low %v6388_v23, %v6404_v40  ;;  %v8016_v37 = vld [vmem:[#allocation28_spill] sm:$0xff] }
  0x78   :  { %v2290_v5 = vrot.slane %v2276_v11, %v5852_v29  ;;  %v2429_v26 = vrot.slane %v2415_v16, %v5852_v29  ;;  %v1211_v30 = vcombine.low %v6408_v13, %v6397_v43  ;;  %v1212_v11 = vcombine.low %v6416_v33, %v6420_v36 }
  0x79   :  { %5342 = vmatmul.mubr.msk.bf16.vlgmr.msra.gmra.mrb[0].mxu1 %vm971_vm2, %v1111_v39  ;;  %v2433_v39 = vcombine.low %v8015_v34, %v6196_v57  ;;  %v1213_v55 = vcombine.low %v8016_v37, %v6423_v46  ;;  %v2422_v6 = vrot.slane %v2414_v18, %v5852_v29  ;;  %v2440_v19 = vrot.slane %v2431_v32, %v5852_v29 }
  0x7a   :  { %5345 = vmatprep.mubr.msk.bf16.mxu1 %vm5770_vm1, %v7986_v15  ;;  %v2291_v28 = vcombine.low %v2283_v45, %v2290_v5  ;;  %5362 = vmatpush3.bf16.msra.mxu1 %v1609_v51  ;;  %v1193_v45 = vcombine.low %v6682_v27, %v1178_v1  ;;  %v1194_v51 = vcombine.low %v1185_v3, %v6690_v56  ;;  %vm4273_vm11 = vcmask 1042434  }
  0x7b   :  { %5569 = vmatprep.subr.bf16.mxu1 %v7986_v15  ;;  %v2447_v44 = vrot.slane %v5163_v61, %v5852_v29  ;;  %v2454_v16 = vrot.slane %v2433_v39, %v5852_v29  ;;  %v6719_v34 = vrot.slane %v1210_v24, %v5852_v29  ;;  %v6724_v18 = vrot.slane %v1211_v30, %v5852_v29  ;;  %v133_v39 = vld [vmem:[%s7911_s1 + $0xc] sm:$0x3]  ;;  %vm4274_vm15 = vmor %vm4272_vm10, %vm4273_vm11 }
  0x7c   :  { %v2298_v5 = vrot.slane %v2291_v28, %v5852_v29  ;;  %v6727_v1 = vrot.slane %v1212_v11, %v5852_v29  ;;  %v6730_v3 = vrot.slane %v1213_v55, %v5852_v29  ;;  %v1260_v32 = vcombine.low %v6521_v21, %v6525_v12  ;;  %v8019_v55 = vld [vmem:[#allocation10_spill] sm:$0xff] }
  0x7d   :  { %8017 = vst [vmem:[#allocation19_spill] sm:$0xff] %v6719_v34  ;;  %8018 = vst [vmem:[#allocation9_spill] sm:$0xff] %v6724_v18  ;;  %v2430_v61 = vcombine.low %v2422_v6, %v2429_v26  ;;  %v1201_v28 = vrot.slane %v1193_v45, %v5852_v29  ;;  %v1208_v24 = vrot.slane %v1194_v51, %v5852_v29  ;;  %v8021_v45 = vld [vmem:[#allocation31_spill] sm:$0xff]  ;;  %vm4275_vm13 = vcmask 1044484  }
  0x7e   :  { %5424 = vmatmul.mubr.msk.bf16.gmra.mrb[16].mxu0 %vm971_vm2, %v2298_v5  ;;  %v2455_v30 = vcombine.low %v2440_v19, %v2447_v44  ;;  %v2456_v11 = vcombine.low %v6682_v27, %v2454_v16  ;;  %v5164_v5 = vcombine.high %v8019_v55, %v6196_v57  ;;  %v5165_v6 = vcombine.high %v6388_v23, %v6404_v40 }
  0x7f   :  { %5429 = vmatprep.mubr.msk.bf16.mxu0 %vm5770_vm1, %v7986_v15  ;;  %v6750_v36 = vrot.slane %v1260_v32, %v5852_v29  ;;  %v2513_v51 = vcombine.low %v8021_v45, %v6423_v46  ;;  %v5166_v19 = vcombine.high %v8016_v37, %v6423_v46  ;;  %v2857_v44 = vsel %vm987_vm0, %v133_v39, 0 }
  0x80   :  { %v1242_v16 = vcombine.low %v6719_v34, %v6724_v18  ;;  %v1209_v22 = vcombine.low %v1201_v28, %v1208_v24  ;;  %v5135_v45 = vcombine.high %v5869_v42, %v5878_v48  ;;  %v2463_v37 = vrot.slane %v2455_v30, %v5852_v29 }
  0x81   :  { %5346 = vmatmul.mubr.msk.bf16.gmra.mrb[4].mxu1 %vm971_vm2, %v1160_v9  ;;  %v8020_v9 = vld [vmem:[#allocation22_spill] sm:$0xff]  ;;  %v2521_v32 = vrot.slane %v2513_v51, %v5852_v29  ;;  %v2528_v38 = vrot.slane %v5166_v19, %v5852_v29  ;;  %v2470_v39 = vrot.slane %v2456_v11, %v5852_v29  ;;  %v2481_v34 = vrot.slane %v5164_v5, %v5852_v29 }
  0x82   :  { %5349 = vmatprep.mubr.msk.bf16.mxu1 %vm5770_vm1, %v7986_v15  ;;  %v2473_v26 = vcombine.low %v8020_v9, %v6404_v40  ;;  %v1243_v9 = vcombine.low %v6727_v1, %v6730_v3  ;;  %v2495_v24 = vrot.slane %v5165_v6, %v5852_v29  ;;  %v8022_v19 = vld [vmem:[#allocation6_spill] sm:$0xff]  ;;  %v1250_v42 = vrot.slane %v1242_v16, %v5852_v29  ;;  %v8023_v16 = vld [vmem:[#allocation4_spill] sm:$0xff] }
  0x83   :  { %v2529_v52 = vcombine.low %v6727_v1, %v2521_v32  ;;  %v2530_v51 = vcombine.low %v2528_v38, %v6750_v36  ;;  %v1374_v18 = vcombine.low %v8022_v19, %v5878_v48  ;;  %v1373_v48 = vcombine.low %v5912_v63, %v5924_v4  ;;  %v8024_v32 = vld [vmem:[#allocation7_spill] sm:$0xff] }
  0x84   :  { %v2488_v28 = vrot.slane %v2473_v26, %v5852_v29  ;;  %v1257_v30 = vrot.slane %v1243_v9, %v5852_v29  ;;  %v2471_v5 = vcombine.low %v2463_v37, %v2470_v39  ;;  %vm4277_vm14 = vcmask 1046534  }
  0x85   :  { %v6786_v11 = vrot.slane %v2529_v52, %v5852_v29  ;;  %v6789_v38 = vrot.slane %v2530_v51, %v5852_v29  ;;  %v1397_v52 = vrot.slane %v5135_v45, %v5852_v29  ;;  %v1383_v63 = vrot.slane %v1373_v48, %v5852_v29  ;;  %v8025_v45 = vld [vmem:[#allocation13_spill] sm:$0xff] }
  0x86   :  { %5430 = vmatmul.mubr.msk.bf16.vlgmr.msra.gmra.mrb[0].mxu0 %vm971_vm2, %v2430_v61  ;;  %v6783_v61 = vrot.slane %v1259_v49, %v5852_v29  ;;  %v2497_v26 = vcombine.low %v2488_v28, %v2495_v24  ;;  %v1258_v6 = vcombine.low %v1250_v42, %v1257_v30  ;;  %v1390_v4 = vrot.slane %v1374_v18, %v5852_v29  ;;  %v8027_v18 = vld [vmem:[#allocation14_spill] sm:$0xff]  ;;  %v8028_v24 = vld [vmem:[#allocation15_spill] sm:$0xff]  ;;  %v38_v30 = vld [vmem:[%s7912_s0 + $0x5c] sm:$0xf] }
  0x87   :  { %5450 = vmatpush3.bf16.msra.mxu0 %v2857_v44  ;;  %5433 = vmatprep.mubr.msk.bf16.mxu0 %vm5770_vm1, %v7986_v15  ;;  %v1406_v9 = vcombine.low %v1397_v52, %v8023_v16  ;;  %v8026_v39 = vcombine.low %v8024_v32, %v8025_v45  ;;  %v8029_v51 = vcombine.low %v8027_v18, %v8028_v24  ;;  %v54_v48 = vld [vmem:[%s7912_s0 + $0x9c] sm:$0xf]  ;;  %v8030_v32 = vld [vmem:[#allocation8_spill] sm:$0xff] }
  0x88   :  { %5471 = vmatprep.subr.bf16.mxu0 %v7986_v15  ;;  %v1275_v44 = vcombine.low %v6783_v61, %v6750_v36  ;;  %v2546_v52 = vcombine.low %v6546_v59, %v6620_v41  ;;  %v1422_v45 = vcombine.low %v8030_v32, %v5893_v53  ;;  %v5136_v18 = vcombine.high %v5875_v47, %v5893_v53  ;;  %v8032_v59 = vld [vmem:[#allocation11_spill] sm:$0xff] }
  0x89   :  { %5350 = vmatmul.mubr.msk.bf16.gmra.mrb[8].mxu1 %vm971_vm2, %v1209_v22  ;;  %v2496_v22 = vcombine.low %v2481_v34, %v6690_v56  ;;  %v2511_v56 = vrot.slane %v2497_v26, %v5852_v29  ;;  %v22_v34 = vld [vmem:[%s7912_s0 + $0x1c] sm:$0xf]  ;;  %v6815_v28 = vrot.slane %v8026_v39, %v5852_v29  ;;  %v6821_v19 = vrot.slane %v8029_v51, %v5852_v29 }
  0x8a   :  { %5353 = vmatprep.mubr.msk.bf16.mxu1 %vm5770_vm1, %v7986_v15  ;;  %v1405_v26 = vcombine.low %v1383_v63, %v1390_v4  ;;  %v5167_v39 = vcombine.high %v6603_v54, %v6620_v41  ;;  %v1425_v24 = vcombine.low %v8032_v59, %v6079_v10  ;;  %v86_v51 = vmax.bf16 %v38_v30, %v22_v34 }
  0x8b   :  { %v2504_v37 = vrot.slane %v2496_v22, %v5852_v29  ;;  %v1282_v22 = vrot.slane %v1275_v44, %v5852_v29  ;;  %v8031_v44 = vld [vmem:[#allocation30_spill] sm:$0xff]  ;;  %v6855_v42 = vrot.slane %v1406_v9, %v5852_v29  ;;  %v5139_v49 = vcombine.high %v6397_v43, %v6416_v33 }
  0x8c   :  { %v1521_v63 = vcombine.low %v8031_v44, %v6416_v33  ;;  %v1523_v47 = vcombine.low %v6423_v46, %v6427_v31  ;;  %v6873_v34 = vrot.slane %v5136_v18, %v5852_v29  ;;  %v8033_v31 = vld [vmem:[#allocation36_spill] sm:$0xff]  ;;  %v5140_v18 = vcombine.high %v6515_v7, %v6521_v21  ;;  %v8034_v44 = vld [vmem:[#allocation21_spill] sm:$0xff] }
  0x8d   :  { %v2512_v4 = vcombine.low %v2504_v37, %v2511_v56  ;;  %v6867_v37 = vrot.slane %v1422_v45, %v5852_v29  ;;  %v6876_v9 = vrot.slane %v5139_v49, %v5852_v29  ;;  %v1569_v30 = vcombine.low %v8033_v31, %v6521_v21  ;;  %v30_v31 = vld [vmem:[%s7912_s0 + $0x3c] sm:$0xf] }
  0x8e   :  { %5434 = vmatmul.mubr.msk.bf16.gmra.mrb[4].mxu0 %vm971_vm2, %v2471_v5  ;;  %v70_v5 = vld [vmem:[%s7912_s0 + $0xdc] sm:$0xf]  ;;  %v6870_v56 = vrot.slane %v1521_v63, %v5852_v29  ;;  %v6879_v46 = vrot.slane %v1523_v47, %v5852_v29  ;;  %v5137_v49 = vcombine.high %v6057_v58, %v6079_v10  ;;  %v1473_v63 = vcombine.low %v8034_v44, %v8013_v60 }
  0x8f   :  { %5437 = vmatprep.mubr.msk.bf16.mxu0 %vm5770_vm1, %v7986_v15  ;;  %v102_v32 = vmax.bf16 %v70_v5, %v54_v48  ;;  %v2561_v48 = vrot.slane %v5167_v39, %v5852_v29  ;;  %v6886_v5 = vrot.slane %v1425_v24, %v5852_v29  ;;  %v6899_v39 = vrot.slane %v1569_v30, %v5852_v29  ;;  %v8035_v24 = vld [vmem:[#allocation12_spill] sm:$0xff] }
  0x90   :  { %v1553_v45 = vcombine.low %v6876_v9, %v6879_v46  ;;  %v5138_v58 = vcombine.high %v6245_v25, %v8013_v60  ;;  %v2718_v59 = vcombine.low %v6606_v8, %v6609_v50  ;;  %v2800_v47 = vcombine.low %v6730_v3, %v6783_v61  ;;  %v62_v3 = vld [vmem:[%s7912_s0 + $0xbc] sm:$0xf] }
  0x91   :  { %5354 = vmatmul.mubr.msk.bf16.gmra.mrb[12].mxu1 %vm971_vm2, %v1258_v6  ;;  %v1520_v6 = vcombine.low %v6404_v40, %v6408_v13  ;;  %v1413_v40 = vrot.slane %v1405_v26, %v5852_v29  ;;  %v2554_v13 = vrot.slane %v2546_v52, %v5852_v29  ;;  %v118_v26 = vmax.bf16 %v102_v32, %v86_v51  ;;  %v78_v61 = vld [vmem:[%s7912_s0 + $0xfc] sm:$0xf] }
  0x92   :  { %5357 = vmatprep.mubr.msk.bf16.mxu1 %vm5770_vm1, %v7986_v15  ;;  %v1455_v51 = vcombine.low %v8035_v24, %v6886_v5  ;;  %v8036_v43 = vcombine.low %v6786_v11, %v6789_v38 }
  0x93   :  { %v6862_v53 = vrot.slane %v1520_v6, %v5852_v29  ;;  %v1472_v6 = vcombine.low %v6256_v17, %v6260_v20  ;;  %v6919_v17 = vrot.slane %v5140_v18, %v5852_v29  ;;  %v2792_v20 = vcombine.low %v6603_v54, %v6620_v41 }
  0x94   :  { %v2677_v32 = vrot.slane %v118_v26, %v5852_v29  ;;  %v1421_v30 = vcombine.low %v1413_v40, %v6855_v42  ;;  %v46_v26 = vld [vmem:[%s7912_s0 + $0x7c] sm:$0xf]  ;;  %v2562_v42 = vcombine.low %v2554_v13, %v2561_v48  ;;  %v6949_v40 = vrot.slane %v5137_v49, %v5852_v29 }
  0x95   :  { %v1552_v52 = vcombine.low %v6862_v53, %v6870_v56  ;;  %v2799_v50 = vrot.slane %v2792_v20, %v5852_v29  ;;  %v1495_v18 = vrot.slane %v1473_v63, %v5852_v29  ;;  %v1502_v20 = vrot.slane %v5138_v58, %v5852_v29 }
  0x96   :  { %5438 = vmatmul.mubr.msk.bf16.gmra.mrb[8].mxu0 %vm971_vm2, %v2512_v4  ;;  %v1454_v4 = vcombine.low %v6867_v37, %v6873_v34  ;;  %v1469_v13 = vrot.slane %v1455_v51, %v5852_v29  ;;  %v6965_v48 = vrot.slane %v2677_v32, %v5852_v29  ;;  %v94_v49 = vmax.bf16 %v46_v26, %v30_v31 }
  0x97   :  { %5441 = vmatprep.mubr.msk.bf16.mxu0 %vm5770_vm1, %v7986_v15  ;;  %v6909_v10 = vrot.slane %v1552_v52, %v5852_v29  ;;  %v2801_v8 = vcombine.low %v6750_v36, %v2799_v50  ;;  %v6957_v52 = vrot.slane %v2800_v47, %v5852_v29  ;;  %v8037_v63 = vcombine.low %v6575_v2, %v6600_v14  ;;  %v8038_v47 = vld [vmem:[#allocation2_spill] sm:$0xff] }
  0x98   :  { %v1462_v44 = vrot.slane %v1454_v4, %v5852_v29  ;;  %v6974_v58 = vrot.slane %v2718_v59, %v5852_v29  ;;  %v2569_v38 = vrot.slane %v2562_v42, %v5852_v29  ;;  %v1865_v2 = vcombine.low %v6515_v7, %v6521_v21 }
  0x99   :  { %5358 = vmatmul.mubr.msk.bf16.gmra.mrb[16].mxu1 %vm971_vm2, %v1282_v22  ;;  %v6916_v22 = vrot.slane %v1553_v45, %v5852_v29  ;;  %v1488_v45 = vrot.slane %v1472_v6, %v5852_v29  ;;  %v110_v6 = vmax.bf16 %v78_v61, %v62_v3  ;;  %v6971_v36 = vrot.slane %v8037_v63, %v5852_v29 }
  0x9a   :  { %5363 = vmatprep.mubr.msk.bf16.mxu1 %vm5770_vm1, %v7986_v15  ;;  %v6979_v11 = vrot.slane %v2801_v8, %v5852_v29  ;;  %v1504_v14 = vcombine.low %v1495_v18, %v1502_v20  ;;  %v2734_v59 = vcombine.low %v8019_v55, %v6196_v57  ;;  %v1470_v31 = vcombine.low %v1462_v44, %v1469_v13 }
  0x9b   :  { %v1503_v4 = vcombine.low %v6949_v40, %v1488_v45  ;;  %v126_v51 = vmax.bf16 %v110_v6, %v94_v49  ;;  %v6997_v7 = vrot.slane %v1865_v2, %v5852_v29  ;;  %v3008_v55 = vcombine.low %v6815_v28, %v6821_v19 }
  0x9c   :  { %v1904_v26 = vcombine.low %v6525_v12, %v6603_v54  ;;  %v1905_v3 = vcombine.low %v6620_v41, %v6624_v0  ;;  %v7010_v61 = vcombine.high %v6965_v48, %v6965_v48  ;;  %v3215_v44 = vcombine.low %v8023_v16, %v6867_v37  ;;  %v134_v41 = vld [vmem:[%s7911_s1 + $0xe] sm:$0x3] }
  0x9d   :  { %v2700_v50 = vrot.slane %v126_v51, %v5852_v29  ;;  %v1888_v18 = vcombine.low %v6879_v46, %v6997_v7  ;;  %v2742_v20 = vrot.slane %v2734_v59, %v5852_v29  ;;  %v3216_v6 = vcombine.low %v6873_v34, %v8035_v24 }
  0x9e   :  { %5442 = vmatmul.mubr.msk.bf16.gmra.mrb[12].mxu0 %vm971_vm2, %v8036_v43  ;;  %v2678_v43 = vcombine.high %v2677_v32, %v2677_v32  ;;  %v2816_v32 = vcombine.low %v6957_v52, %v6979_v11  ;;  %v7021_v12 = vrot.slane %v1904_v26, %v5852_v29  ;;  %v7024_v54 = vrot.slane %v1905_v3, %v5852_v29  ;;  %v8042_v3 = vld [vmem:[#allocation40_spill] sm:$0xff] }
  0x9f   :  { %5445 = vmatprep.mubr.msk.bf16.mxu0 %vm5770_vm1, %v7986_v15  ;;  %v2701_v42 = vcombine.high %v2700_v50, %v2700_v50  ;;  %v7013_v45 = vrot.slane %v2700_v50, %v5852_v29  ;;  %v1511_v63 = vrot.slane %v1503_v4, %v5852_v29  ;;  %v3132_v34 = vsel %vm987_vm0, %v134_v41, 0 }
  0xa0   :  { %v7000_v21 = vrot.slane %v2678_v43, %v5852_v29  ;;  %v1518_v43 = vrot.slane %v1504_v14, %v5852_v29  ;;  %v2750_v24 = vcombine.low %v6613_v35, %v6682_v27  ;;  %v1824_v4 = vcombine.low %v6269_v62, %v6388_v23  ;;  %v8041_v27 = vld [vmem:[#allocation41_spill] sm:$0xff] }
  0xa1   :  { %5364 = vmatmul.mubr.msk.bf16.vlgmr.msra.gmra.mrb[0].mxu1 %vm971_vm2, %v1421_v30  ;;  %v8039_v30 = vld [vmem:[#allocation23_spill] sm:$0xff]  ;;  %v7032_v49 = vrot.slane %v2701_v42, %v5852_v29  ;;  %v2716_v16 = vcombine.high %v7013_v45, %v7013_v45  ;;  %v2817_v37 = vcombine.low %v6624_v0, %v7013_v45  ;;  %v2733_v14 = vcombine.low %v6971_v36, %v6974_v58  ;;  %v8043_v58 = vld [vmem:[#allocation37_spill] sm:$0xff] }
  0xa2   :  { %5367 = vmatprep.mubr.msk.bf16.mxu1 %vm5770_vm1, %v7986_v15  ;;  %5570 = vmatpush3.bf16.msra.mxu1 %v8038_v47  ;;  %v2735_v8 = vcombine.low %v8039_v30, %v6965_v48  ;;  %v2767_v51 = vcombine.low %v7000_v21, %v7010_v61  ;;  %v8040_v47 = vld [vmem:[#allocation9_spill] sm:$0xff]  ;;  %v7068_v50 = vrot.slane %v3215_v44, %v5852_v29  ;;  %v8044_v42 = vld [vmem:[#allocation35_spill] sm:$0xff] }
  0xa3   :  { %v2818_v0 = vcombine.low %v7032_v49, %v2716_v16  ;;  %v7051_v2 = vrot.slane %v2817_v37, %v5852_v29  ;;  %v7071_v26 = vrot.slane %v3216_v6, %v5852_v29  ;;  %v1519_v35 = vcombine.low %v1511_v63, %v1518_v43  ;;  %v8045_v43 = vld [vmem:[#allocation38_spill] sm:$0xff] }
  0xa4   :  { %v2749_v13 = vrot.slane %v2735_v8, %v5852_v29  ;;  %v3067_v62 = vcombine.low %v8042_v3, %v8041_v27  ;;  %v2774_v23 = vrot.slane %v2767_v51, %v5852_v29  ;;  %v1822_v36 = vcombine.low %v6196_v57, %v8039_v30 }
  0xa5   :  { %v7065_v8 = vrot.slane %v2818_v0, %v5852_v29  ;;  %v2758_v44 = vrot.slane %v2750_v24, %v5852_v29  ;;  %v7084_v41 = vrot.slane %v1824_v4, %v5852_v29  ;;  %v2941_v37 = vcombine.high %v7032_v49, %v7032_v49 }
  0xa6   :  { %5446 = vmatmul.mubr.msk.bf16.gmra.mrb[16].mxu0 %vm971_vm2, %v2569_v38  ;;  %v1920_v38 = vcombine.low %v7021_v12, %v7024_v54  ;;  %v2751_v59 = vcombine.low %v2742_v20, %v2749_v13  ;;  %v3075_v20 = vcombine.low %v8044_v42, %v8043_v58  ;;  %v3074_v13 = vrot.slane %v3067_v62, %v5852_v29  ;;  %v8061_v12 = vld [vmem:[#allocation32_spill] sm:$0xff] }
  0xa7   :  { %5451 = vmatprep.mubr.msk.bf16.mxu0 %vm5770_vm1, %v7986_v15  ;;  %v1823_v6 = vcombine.low %v6245_v25, %v8013_v60  ;;  %v2968_v0 = vshrl.u32 %v7013_v45, 16  ;;  %v2973_v24 = vshll.u32 %v7032_v49, 16  ;;  %v2976_v4 = vshrl.u32 %v7032_v49, 16 }
  0xa8   :  { %v2765_v57 = vrot.slane %v2751_v59, %v5852_v29  ;;  %v7097_v63 = vrot.slane %v3075_v20, %v5852_v29  ;;  %v3076_v51 = vcombine.low %v8045_v43, %v3074_v13  ;;  %v1831_v25 = vrot.slane %v1822_v36, %v5852_v29  ;;  %v8048_v36 = vld [vmem:[#allocation42_spill] sm:$0xff] }
  0xa9   :  { %5368 = vmatmul.mubr.msk.bf16.gmra.mrb[4].mxu1 %vm971_vm2, %v1470_v31  ;;  %v2776_v31 = vcombine.low %v8040_v47, %v6727_v1  ;;  %v2833_v1 = vcombine.low %v7051_v2, %v7065_v8  ;;  %v2981_v60 = vshll.u32 %v2716_v16, 16  ;;  %v2975_v27 = vsel %vm5926_vm3, %v2968_v0, %v2973_v24 }
  0xaa   :  { %5371 = vmatprep.mubr.msk.bf16.mxu1 %vm5770_vm1, %v7986_v15  ;;  %v7112_v47 = vrot.slane %v3076_v51, %v5852_v29  ;;  %v2989_v3 = vshll.u32 %v2941_v37, 16  ;;  %v2766_v62 = vcombine.low %v2758_v44, %v2765_v57  ;;  %v3092_v58 = vcombine.low %v8048_v36, %v2975_v27  ;;  %v8050_v27 = vld [vmem:[#allocation39_spill] sm:$0xff] }
  0xab   :  { %v7092_v30 = vrot.slane %v2776_v31, %v5852_v29  ;;  %v3240_v37 = vcombine.low %v6886_v5, %v6949_v40  ;;  %v5189_v44 = vcombine.high %v6965_v48, %v7000_v21  ;;  %v1838_v57 = vrot.slane %v1823_v6, %v5852_v29 }
  0xac   :  { %v3091_v20 = vcombine.low %v7097_v63, %v7112_v47  ;;  %v7133_v51 = vrot.slane %v3092_v58, %v5852_v29  ;;  %v3282_v5 = vcombine.low %v6879_v46, %v6899_v39  ;;  %v1902_v52 = vrot.slane %v1888_v18, %v5852_v29 }
  0xad   :  { %v2840_v11 = vrot.slane %v2833_v1, %v5852_v29  ;;  %v2959_v46 = vshrl.u32 %v7010_v61, 16  ;;  %v8059_v1 = vld [vmem:[#allocation20_spill] sm:$0xff]  ;;  %v1927_v31 = vrot.slane %v1920_v38, %v5852_v29  ;;  %v8062_v38 = vld [vmem:[#allocation34_spill] sm:$0xff] }
  0xae   :  { %5452 = vmatmul.mubr.msk.bf16.vlgmr.msra.gmra.mrb[0].mxu0 %vm971_vm2, %v2733_v14  ;;  %v8046_v14 = vld [vmem:[#allocation19_spill] sm:$0xff] }
  0xaf   :  { %5472 = vmatpush3.bf16.msra.mxu0 %v3132_v34  ;;  %5455 = vmatprep.mubr.msk.bf16.mxu0 %vm5770_vm1, %v7986_v15  ;;  %v2775_v59 = vcombine.low %v2774_v23, %v8046_v14  ;;  %v2984_v34 = vshrl.u32 %v2716_v16, 16  ;;  %v2983_v23 = vsel %vm5926_vm3, %v2976_v4, %v2981_v60  ;;  %v8049_v16 = vld [vmem:[#allocation24_spill] sm:$0xff]  ;;  %v3264_v4 = vrot.slane %v5189_v44, %v5852_v29 }
  0xb0   :  { %5493 = vmatprep.subr.bf16.mxu0 %v7986_v15  ;;  %v3232_v42 = vcombine.low %v8049_v16, %v7000_v21  ;;  %v3266_v14 = vcombine.low %v6870_v56, %v6876_v9  ;;  %v7147_v60 = vrot.slane %v3240_v37, %v5852_v29  ;;  %v5190_v16 = vcombine.high %v7013_v45, %v7032_v49 }
  0xb1   :  { %5372 = vmatmul.mubr.msk.bf16.gmra.mrb[8].mxu1 %vm971_vm2, %v1519_v35  ;;  %v3231_v35 = vcombine.low %v7068_v50, %v7071_v26  ;;  %v2991_v13 = vsel %vm5926_vm3, %v2984_v34, %v2989_v3  ;;  %v2783_v24 = vrot.slane %v2775_v59, %v5852_v29  ;;  %v3283_v59 = vcombine.low %v6919_v17, %v7024_v54 }
  0xb2   :  { %5375 = vmatprep.mubr.msk.bf16.mxu1 %vm5770_vm1, %v7986_v15  ;;  %v3093_v43 = vcombine.low %v2983_v23, %v2991_v13  ;;  %v3239_v0 = vrot.slane %v3232_v42, %v5852_v29  ;;  %v3265_v56 = vcombine.low %v3264_v4, %v6862_v53  ;;  %v7155_v9 = vrot.slane %v3266_v14, %v5852_v29  ;;  %v8054_v14 = vld [vmem:[#allocation28_spill] sm:$0xff] }
  0xb3   :  { %v7158_v34 = vrot.slane %v3282_v5, %v5852_v29  ;;  %v3299_v3 = vcombine.low %v8050_v27, %v7032_v49  ;;  %v7172_v58 = vrot.slane %v3283_v59, %v5852_v29  ;;  %v7190_v44 = vrot.slane %v5190_v16, %v5852_v29  ;;  %v8055_v5 = vld [vmem:[#allocation29_spill] sm:$0xff] }
  0xb4   :  { %v7144_v40 = vrot.slane %v3093_v43, %v5852_v29  ;;  %v3241_v6 = vcombine.low %v1831_v25, %v3239_v0  ;;  %v7179_v42 = vrot.slane %v3265_v56, %v5852_v29  ;;  %v1847_v45 = vcombine.low %v7084_v41, %v6862_v53 }
  0xb5   :  { %v3298_v37 = vcombine.low %v7158_v34, %v7172_v58  ;;  %v8052_v49 = vcombine.low %v6899_v39, %v6919_v17  ;;  %v1846_v0 = vcombine.low %v1831_v25, %v1838_v57  ;;  %v2943_v41 = vshrl.u32 %v6965_v48, 16 }
  0xb6   :  { %5456 = vmatmul.mubr.msk.bf16.gmra.mrb[4].mxu0 %vm971_vm2, %v2766_v62  ;;  %v8051_v62 = vcombine.low %v6909_v10, %v6916_v22  ;;  %v3108_v23 = vcombine.low %v7133_v51, %v7144_v40  ;;  %v7169_v36 = vrot.slane %v3241_v6, %v5852_v29  ;;  %v7182_v10 = vrot.slane %v3299_v3, %v5852_v29 }
  0xb7   :  { %5459 = vmatprep.mubr.msk.bf16.mxu0 %vm5770_vm1, %v7986_v15  ;;  %v2791_v22 = vcombine.low %v2783_v24, %v7092_v30  ;;  %v1592_v43 = vrot.slane %v8052_v49, %v5852_v29  ;;  %v3281_v30 = vcombine.low %v7179_v42, %v7155_v9  ;;  %v8053_v24 = vld [vmem:[#allocation27_spill] sm:$0xff]  ;;  %v1864_v6 = vcombine.low %v8055_v5, %v8054_v14 }
  0xb8   :  { %v3256_v13 = vcombine.low %v7147_v60, %v7169_v36  ;;  %v1863_v4 = vcombine.low %v8053_v24, %v6416_v33  ;;  %v3315_v59 = vcombine.low %v7182_v10, %v7190_v44  ;;  %v1854_v53 = vrot.slane %v1846_v0, %v5852_v29  ;;  %v8060_v24 = vld [vmem:[#allocation16_spill] sm:$0xff] }
  0xb9   :  { %5376 = vmatmul.mubr.msk.bf16.gmra.mrb[12].mxu1 %vm971_vm2, %v8051_v62  ;;  %v1861_v39 = vrot.slane %v1847_v45, %v5852_v29  ;;  %v1879_v33 = vrot.slane %v1864_v6, %v5852_v29  ;;  %v2948_v25 = vshll.u32 %v7000_v21, 16  ;;  %v2940_v3 = vcombine.high %v7000_v21, %v7000_v21  ;;  %v8057_v62 = vld [vmem:[#allocation18_spill] sm:$0xff] }
  0xba   :  { %5379 = vmatprep.mubr.msk.bf16.mxu1 %vm5770_vm1, %v7986_v15  ;;  %v1872_v17 = vrot.slane %v1863_v4, %v5852_v29  ;;  %v2951_v49 = vshrl.u32 %v7000_v21, 16  ;;  %v3025_v4 = vcombine.low %v8060_v24, %v8059_v1  ;;  %v3322_v50 = vrot.slane %v3315_v59, %v5852_v29  ;;  %v3888_v59 = vld [vmem:[%s7913_s2 + $0x4] sm:$0xf] }
  0xbb   :  { %v1862_v57 = vcombine.low %v1854_v53, %v1861_v39  ;;  %v2950_v27 = vsel %vm5926_vm3, %v2943_v41, %v2948_v25  ;;  %v2964_v7 = vshll.u32 %v2940_v3, 16  ;;  %v8063_v41 = vld [vmem:[#allocation33_spill] sm:$0xff] }
  0xbc   :  { %v1887_v56 = vcombine.low %v1872_v17, %v1879_v33  ;;  %v3033_v53 = vrot.slane %v3025_v4, %v5852_v29  ;;  %v3051_v28 = vcombine.low %v8063_v41, %v8062_v38 }
  0xbd   :  { %v2966_v21 = vsel %vm5926_vm3, %v2959_v46, %v2964_v7 }
  0xbe   :  { %5460 = vmatmul.mubr.msk.bf16.gmra.mrb[8].mxu0 %vm971_vm2, %v2791_v22  ;;  %v1895_v48 = vrot.slane %v1887_v56, %v5852_v29  ;;  %v8058_v22 = vld [vmem:[#allocation26_spill] sm:$0xff] }
  0xbf   :  { %5463 = vmatprep.mubr.msk.bf16.mxu0 %vm5770_vm1, %v7986_v15  ;;  %v3010_v45 = vcombine.low %v8058_v22, %v2950_v27 }
  0xc0   :  { %v1903_v18 = vcombine.low %v1895_v48, %v1902_v52 }
  0xc1   :  { %5380 = vmatmul.mubr.msk.bf16.gmra.mrb[16].mxu1 %vm971_vm2, %v1592_v43  ;;  %v2956_v43 = vshll.u32 %v7010_v61, 16  ;;  %v3024_v2 = vrot.slane %v3010_v45, %v5852_v29  ;;  %v135_v61 = vld [vmem:[%s7911_s1 + $0x10] sm:$0x3] }
  0xc2   :  { %5393 = vmatprep.mubr.msk.bf16.mxu1 %vm5770_vm1, %v7986_v15  ;;  %v3339_v6 = vsel %vm987_vm0, %v135_v61, 0  ;;  %vm4127_vm0 = vcmask 1043456  }
  0xc3   :  { %v2958_v8 = vsel %vm5926_vm3, %v2951_v49, %v2956_v43  ;;  %5752 = vmatprep.subr.msk.bf16.mxu1 %vm4127_vm0, %v3888_v59  ;;  %v4129_v3 = vsel %vm4127_vm0, %v3888_v59, 0 }
  0xc4   :  { %v3042_v5 = vcombine.low %v2958_v8, %v2966_v21 }
  0xc6   :  { %5464 = vmatmul.mubr.msk.bf16.gmra.mrb[12].mxu0 %vm971_vm2, %v2816_v32  ;;  %v8056_v32 = vld [vmem:[#allocation25_spill] sm:$0xff]  ;;  %v3049_v17 = vrot.slane %v3042_v5, %v5852_v29 }
  0xc7   :  { %5467 = vmatprep.mubr.msk.bf16.mxu0 %vm5770_vm1, %v7986_v15  ;;  %v3009_v16 = vcombine.low %v8057_v62, %v8056_v32 }
  0xc8   :  { %v3050_v54 = vcombine.low %v3049_v17, %v8061_v12 }
  0xc9   :  { %5394 = vmatmul.mubr.msk.bf16.vlgmr.msra.gmra.mrb[8].mxu1 %vm971_vm2, %v1862_v57  ;;  %v3017_v0 = vrot.slane %v3009_v16, %v5852_v29  ;;  %v3115_v57 = vrot.slane %v3108_v23, %v5852_v29 }
  0xca   :  { %5397 = vmatprep.mubr.msk.bf16.mxu1 %vm5770_vm1, %v7986_v15  ;;  %v3058_v19 = vrot.slane %v3050_v54, %v5852_v29  ;;  %5516 = vmatpush3.bf16.msra.mxu1 %v4129_v3 }
  0xcb   :  { %v3026_v14 = vcombine.low %v3017_v0, %v3024_v2 }
  0xcd   :  { %v3040_v39 = vrot.slane %v3026_v14, %v5852_v29 }
  0xce   :  { %5468 = vmatmul.mubr.msk.bf16.gmra.mrb[16].mxu0 %vm971_vm2, %v2840_v11 }
  0xcf   :  { %5473 = vmatprep.mubr.msk.bf16.mxu0 %vm5770_vm1, %v7986_v15  ;;  %v3041_v33 = vcombine.low %v3033_v53, %v3040_v39  ;;  %v7345_v39 = vld [vmem:[%s7913_s2] sm:$0xf] }
  0xd0   :  { %5753 = vmatprep.subr.msk.bf16.mxu1 %vm4127_vm0, %v7345_v39 }
  0xd1   :  { %5398 = vmatmul.mubr.msk.bf16.gmra.mrb[12].mxu1 %vm971_vm2, %v1903_v18 }
  0xd2   :  { %5401 = vmatprep.mubr.msk.bf16.mxu1 %vm5770_vm1, %v7986_v15 }
  0xd6   :  { %5474 = vmatmul.mubr.msk.bf16.vlgmr.msra.gmra.mrb[0].mxu0 %vm971_vm2, %v3008_v55  ;;  %v3065_v55 = vrot.slane %v3051_v28, %v5852_v29 }
  0xd7   :  { %5494 = vmatpush3.bf16.msra.mxu0 %v3339_v6  ;;  %5477 = vmatprep.mubr.msk.bf16.mxu0 %vm5770_vm1, %v7986_v15 }
  0xd8   :  { %v3066_v25 = vcombine.low %v3058_v19, %v3065_v55 }
  0xd9   :  { %5402 = vmatmul.mubr.msk.bf16.gmra.mrb[16].mxu1 %vm971_vm2, %v1927_v31 }
  0xde   :  { %5478 = vmatmul.mubr.msk.bf16.gmra.mrb[4].mxu0 %vm971_vm2, %v3041_v33 }
  0xdf   :  { %5481 = vmatprep.mubr.msk.bf16.mxu0 %vm5770_vm1, %v7986_v15 }
  0xe6   :  { %5482 = vmatmul.mubr.msk.bf16.gmra.mrb[8].mxu0 %vm971_vm2, %v3066_v25 }
  0xe7   :  { %5485 = vmatprep.mubr.msk.bf16.mxu0 %vm5770_vm1, %v7986_v15 }
  0xee   :  { %5486 = vmatmul.mubr.msk.bf16.gmra.mrb[12].mxu0 %vm971_vm2, %v3091_v20 }
  0xef   :  { %5489 = vmatprep.mubr.msk.bf16.mxu0 %vm5770_vm1, %v7986_v15 }
  0xf6   :  { %5490 = vmatmul.mubr.msk.bf16.gmra.mrb[16].mxu0 %vm971_vm2, %v3115_v57 }
  0xf7   :  { %5495 = vmatprep.mubr.msk.bf16.mxu0 %vm5770_vm1, %v7986_v15 }
  0xfe   :  { %5496 = vmatmul.mubr.msk.bf16.vlgmr.msra.gmra.mrb[0].mxu0 %vm971_vm2, %v3231_v35 }
  0xff   :  { %5499 = vmatprep.mubr.msk.bf16.mxu0 %vm5770_vm1, %v7986_v15 }
 0x106   :  { %5500 = vmatmul.mubr.msk.bf16.gmra.mrb[4].mxu0 %vm971_vm2, %v3256_v13 }
 0x107   :  { %5503 = vmatprep.mubr.msk.bf16.mxu0 %vm5770_vm1, %v7986_v15 }
 0x10e   :  { %5504 = vmatmul.mubr.msk.bf16.gmra.mrb[8].mxu0 %vm971_vm2, %v3281_v30 }
 0x10f   :  { %5507 = vmatprep.mubr.msk.bf16.mxu0 %vm5770_vm1, %v7986_v15 }
 0x116   :  { %5508 = vmatmul.mubr.msk.bf16.gmra.mrb[12].mxu0 %vm971_vm2, %v3298_v37 }
 0x117   :  { %5511 = vmatprep.mubr.msk.bf16.mxu0 %vm5770_vm1, %v7986_v15  ;;  %vm3422_vm1 = vcmask 64512  }
 0x11e   :  { %5512 = vmatmul.mubr.msk.bf16.gmra.mrb[16].mxu0 %vm971_vm2, %v3322_v50  ;;  %vm4276_vm2 = vmor %vm4274_vm15, %vm4275_vm13 }
 0x11f   :  { %vm7616_vm3 = vmor %vm4276_vm2, %vm4277_vm14 }
 0x174   :  { %v1645_v26 = vpop.f32.mrb[0].mxu1 }
 0x175   :  { %v5365_v63 = vpop.f32.mrb[1].mxu1 }
 0x176   :  { %v1648_v47 = vpop.f32.mrb[2].mxu1 }
 0x177   :  { %v5366_v35 = vpop.f32.mrb[3].mxu1 }
 0x17c   :  { %v1653_v20 = vpop.f32.mrb[4].mxu1 }
 0x17d   :  { %v5369_v51 = vpop.f32.mrb[5].mxu1 }
 0x17e   :  { %v1656_v40 = vpop.f32.mrb[6].mxu1 }
 0x17f   :  { %v5370_v60 = vpop.f32.mrb[7].mxu1 }
 0x19c   :  { %v1996_v9 = vpop.f32.mrb[8].mxu1 }
 0x19d   :  { %v5395_v34 = vpop.f32.mrb[9].mxu1 }
 0x19e   :  { %v1999_v23 = vpop.f32.mrb[10].mxu1 }
 0x19f   :  { %v5396_v36 = vpop.f32.mrb[11].mxu1 }
 0x1a4   :  { %v2004_v15 = vpop.f32.mrb[12].mxu1 }
 0x1a5   :  { %v5399_v58 = vpop.f32.mrb[13].mxu1 }
 0x1a6   :  { %v2007_v42 = vpop.f32.mrb[14].mxu1 }
 0x1a7   :  { %v5400_v13 = vpop.f32.mrb[15].mxu1 }
 0x1ac   :  { %v2012_v10 = vpop.f32.mrb[16].mxu1 }
 0x1ad   :  { %v5403_v29 = vpop.f32.mrb[17].mxu1 }
 0x1ae   :  { %v2015_v37 = vpop.f32.mrb[18].mxu1 }
 0x1af   :  { %v5404_v44 = vpop.f32.mrb[19].mxu1 }
 0x1d1   :  { %v3375_v30 = vpop.f32.mrb[0].mxu0 }
 0x1d2   :  { %v5571_v56 = vadd.f32 %v3375_v30, %v1645_v26  ;;  %v5497_v27 = vpop.f32.mrb[1].mxu0 }
 0x1d3   :  { %v3378_v48 = vpop.f32.mrb[2].mxu0 }
 0x1d4   :  { %v5572_v52 = vadd.f32 %v3378_v48, %v1648_v47  ;;  %v5498_v11 = vpop.f32.mrb[3].mxu0  ;;  %v3423_v32 = vsel %vm3422_vm1, %v5571_v56, 0.0 }
 0x1d6   :  { %v3424_v62 = vsel %vm3422_vm1, %v5572_v52, 0.0 }
 0x1d7   :  { %v3425_v16 = vadd.f32 %v3424_v62, %v3423_v32 }
 0x1d9   :  { %v3383_v22 = vpop.f32.mrb[4].mxu0 }
 0x1da   :  { %v5573_v45 = vadd.f32 %v3383_v22, %v1653_v20  ;;  %v5501_v49 = vpop.f32.mrb[5].mxu0 }
 0x1db   :  { %v3386_v43 = vpop.f32.mrb[6].mxu0 }
 0x1dc   :  { %v3426_v46 = vsel %vm3422_vm1, %v5573_v45, 0.0  ;;  %v5574_v7 = vadd.f32 %v3386_v43, %v1656_v40  ;;  %v5502_v18 = vpop.f32.mrb[7].mxu0 }
 0x1dd   :  { %v3427_v0 = vadd.f32 %v3426_v46, %v3425_v16 }
 0x1de   :  { %v3428_v2 = vsel %vm3422_vm1, %v5574_v7, 0.0 }
 0x1df   :  { %v3429_v8 = vadd.f32 %v3428_v2, %v3427_v0 }
 0x1e1   :  { %v3391_v21 = vpop.f32.mrb[8].mxu0 }
 0x1e2   :  { %v5575_v61 = vadd.f32 %v3391_v21, %v1996_v9  ;;  %v5505_v1 = vpop.f32.mrb[9].mxu0 }
 0x1e3   :  { %v3394_v24 = vpop.f32.mrb[10].mxu0 }
 0x1e4   :  { %v3430_v4 = vsel %vm3422_vm1, %v5575_v61, 0.0  ;;  %v5576_v14 = vadd.f32 %v3394_v24, %v1999_v23  ;;  %v5506_v5 = vpop.f32.mrb[11].mxu0 }
 0x1e5   :  { %v3431_v6 = vadd.f32 %v3430_v4, %v3429_v8 }
 0x1e6   :  { %v3432_v31 = vsel %vm3422_vm1, %v5576_v14, 0.0 }
 0x1e7   :  { %v3433_v53 = vadd.f32 %v3432_v31, %v3431_v6 }
 0x1e9   :  { %v3399_v17 = vpop.f32.mrb[12].mxu0 }
 0x1ea   :  { %v5577_v33 = vadd.f32 %v3399_v17, %v2004_v15  ;;  %v5509_v12 = vpop.f32.mrb[13].mxu0 }
 0x1eb   :  { %v3402_v54 = vpop.f32.mrb[14].mxu0 }
 0x1ec   :  { %v3434_v38 = vsel %vm3422_vm1, %v5577_v33, 0.0  ;;  %v5578_v41 = vadd.f32 %v3402_v54, %v2007_v42  ;;  %v5510_v28 = vpop.f32.mrb[15].mxu0 }
 0x1ed   :  { %v3435_v19 = vadd.f32 %v3434_v38, %v3433_v53  ;;  %v5772_v38 = vmov 1983009808  }
 0x1ee   :  { %v3436_v55 = vsel %vm3422_vm1, %v5578_v41, 0.0 }
 0x1ef   :  { %v3437_v25 = vadd.f32 %v3436_v55, %v3435_v19  ;;  %v8064_v55 = vld [vmem:[#allocation3_spill] sm:$0xff] }
 0x1f1   :  { %v3407_v57 = vpop.f32.mrb[16].mxu0 }
 0x1f2   :  { %v5579_v50 = vadd.f32 %v3407_v57, %v2012_v10  ;;  %v5513_v26 = vpop.f32.mrb[17].mxu0 }
 0x1f3   :  { %v3410_v63 = vpop.f32.mrb[18].mxu0 }
 0x1f4   :  { %v3438_v47 = vsel %vm3422_vm1, %v5579_v50, 0.0  ;;  %v5514_v35 = vpop.f32.mrb[19].mxu0 }
 0x1f5   :  { %v3439_v20 = vadd.f32 %v3438_v47, %v3437_v25 }
 0x1f7   :  { %v3440_v51 = vrot.slane %v3439_v20, 4 }
 0x1f9   :  { %v3441_v40 = vadd.f32 %v3440_v51, %v3439_v20 }
 0x1fb   :  { %v3442_v60 = vrot.slane %v3441_v40, 2 }
 0x1fd   :  { %v3443_v9 = vadd.f32 %v3442_v60, %v3441_v40 }
 0x1ff   :  { %v3444_v34 = vrot.slane %v3443_v9, 1 }
 0x201   :  { %v3445_v23 = vadd.f32 %v3444_v34, %v3443_v9 }
 0x203   :  { %v3446_v36 = vmul.f32 0.013888889, %v3445_v23 }
 0x205   :  { %v3447_v15 = vsub.f32 %v5571_v56, %v3446_v36  ;;  %v3448_v58 = vsub.f32 %v5572_v52, %v3446_v36  ;;  %v3449_v42 = vsub.f32 %v5573_v45, %v3446_v36  ;;  %v7352_v13 = vsub.f32 %v5574_v7, %v3446_v36 }
 0x206   :  { %v3451_v29 = vsub.f32 %v5575_v61, %v3446_v36  ;;  %v3452_v10 = vsub.f32 %v5576_v14, %v3446_v36  ;;  %v3453_v37 = vsub.f32 %v5577_v33, %v3446_v36  ;;  %v3454_v44 = vsub.f32 %v5578_v41, %v3446_v36 }
 0x207   :  { %v3455_v30 = vsub.f32 %v5579_v50, %v3446_v36  ;;  %v3456_v59 = vmul.f32 %v3447_v15, %v3447_v15  ;;  %v3457_v27 = vmul.f32 %v3448_v58, %v3448_v58  ;;  %v3458_v3 = vmul.f32 %v3449_v42, %v3449_v42 }
 0x208   :  { %v3459_v48 = vmul.f32 %v7352_v13, %v7352_v13  ;;  %v3460_v52 = vmul.f32 %v3451_v29, %v3451_v29  ;;  %v3461_v22 = vmul.f32 %v3452_v10, %v3452_v10  ;;  %v3462_v43 = vmul.f32 %v3453_v37, %v3453_v37 }
 0x209   :  { %v3465_v11 = vsel %vm3422_vm1, %v3456_v59, 0.0  ;;  %v3466_v32 = vsel %vm3422_vm1, %v3457_v27, 0.0  ;;  %v3468_v62 = vsel %vm3422_vm1, %v3458_v3, 0.0  ;;  %v3463_v18 = vmul.f32 %v3454_v44, %v3454_v44 }
 0x20a   :  { %v3467_v56 = vadd.f32 %v3466_v32, %v3465_v11  ;;  %v3470_v45 = vsel %vm3422_vm1, %v3459_v48, 0.0  ;;  %v3472_v46 = vsel %vm3422_vm1, %v3460_v52, 0.0  ;;  %v3474_v0 = vsel %vm3422_vm1, %v3461_v22, 0.0 }
 0x20b   :  { %v3464_v8 = vmul.f32 %v3455_v30, %v3455_v30  ;;  %v3476_v21 = vsel %vm3422_vm1, %v3462_v43, 0.0  ;;  %v3478_v1 = vsel %vm3422_vm1, %v3463_v18, 0.0  ;;  %v3520_v41 = vunpack.c.l.s4 %v5772_v38 }
 0x20c   :  { %v3469_v16 = vadd.f32 %v3468_v62, %v3467_v56 }
 0x20d   :  { %v3480_v4 = vsel %vm3422_vm1, %v3464_v8, 0.0  ;;  %v3521_v28 = vunpack.c.0.s8 %v3520_v41 }
 0x20e   :  { %v3471_v49 = vadd.f32 %v3470_v45, %v3469_v16 }
 0x20f   :  { %v7368_v25 = vsub.s32 %v3521_v28, %v8064_v55 }
 0x210   :  { %v3473_v7 = vadd.f32 %v3472_v46, %v3471_v49 }
 0x212   :  { %v3475_v2 = vadd.f32 %v3474_v0, %v3473_v7 }
 0x214   :  { %v3477_v61 = vadd.f32 %v3476_v21, %v3475_v2 }
 0x216   :  { %v3479_v24 = vadd.f32 %v3478_v1, %v3477_v61 }
 0x218   :  { %v3481_v14 = vadd.f32 %v3480_v4, %v3479_v24 }
 0x21a   :  { %v3482_v5 = vrot.slane %v3481_v14, 4 }
 0x21c   :  { %v3483_v6 = vadd.f32 %v3482_v5, %v3481_v14 }
 0x21e   :  { %v3484_v31 = vrot.slane %v3483_v6, 2 }
 0x220   :  { %v3485_v53 = vadd.f32 %v3484_v31, %v3483_v6 }
 0x222   :  { %v3486_v17 = vrot.slane %v3485_v53, 1 }
 0x224   :  { %v3487_v33 = vadd.f32 %v3486_v17, %v3485_v53 }
 0x226   :  { %v3488_v12 = vmul.f32 0.013888889, %v3487_v33 }
 0x228   :  { %v3489_v54 = vadd.f32 1e-05, %v3488_v12 }
 0x22a   :  { %5765 = vrsqrt.f32 %v3489_v54 }
 0x234   :  { %v7365_v19 = vpop.eup %5765 }
 0x235   :  { %v3491_v57 = vmul.f32 %v7365_v19, %v3447_v15  ;;  %v3492_v50 = vmul.f32 %v7365_v19, %v3448_v58  ;;  %v3493_v26 = vmul.f32 %v7365_v19, %v3449_v42  ;;  %v3495_v63 = vmul.f32 %v7365_v19, %v3451_v29 }
 0x236   :  { %v3496_v47 = vmul.f32 %v7365_v19, %v3452_v10  ;;  %v3497_v35 = vmul.f32 %v7365_v19, %v3453_v37  ;;  %v3498_v20 = vmul.f32 %v7365_v19, %v3454_v44  ;;  %v3499_v51 = vmul.f32 %v7365_v19, %v3455_v30 }
 0x237   :  { %v3500_v40 = vmax.f32 %v3491_v57, 0.0  ;;  %v3501_v60 = vmax.f32 %v3492_v50, 0.0  ;;  %v3502_v9 = vmax.f32 %v3493_v26, 0.0  ;;  %v7378_v34 = vmax.f32 %v3495_v63, 0.0 }
 0x238   :  { %v3505_v23 = vmax.f32 %v3496_v47, 0.0  ;;  %v3506_v36 = vmax.f32 %v3497_v35, 0.0  ;;  %v3507_v15 = vmax.f32 %v3498_v20, 0.0  ;;  %v3508_v58 = vmax.f32 %v3499_v51, 0.0 }
 0x239   :  { %v3518_v42 = vcombine.high %v3500_v40, %v3500_v40  ;;  %v3525_v29 = vrot.slane %v3500_v40, %v7368_v25  ;;  %v3535_v59 = vcombine.high %v3501_v60, %v3501_v60  ;;  %v3542_v10 = vrot.slane %v3501_v60, %v7368_v25 }
 0x23a   :  { %v3552_v37 = vcombine.high %v3502_v9, %v3502_v9  ;;  %v3559_v44 = vrot.slane %v3502_v9, %v7368_v25  ;;  %v3586_v30 = vcombine.high %v7378_v34, %v7378_v34  ;;  %v3603_v27 = vcombine.high %v3505_v23, %v3505_v23 }
 0x23b   :  { %v7386_v3 = vrot.slane %v3518_v42, %v7368_v25  ;;  %v3533_v48 = vcombine.high %v3525_v29, %v3525_v29  ;;  %v3549_v11 = vrot.slane %v3535_v59, %v7368_v25  ;;  %v3550_v32 = vcombine.high %v3542_v10, %v3542_v10 }
 0x23c   :  { %v3566_v56 = vrot.slane %v3552_v37, %v7368_v25  ;;  %v3567_v52 = vcombine.high %v3559_v44, %v3559_v44  ;;  %v3600_v62 = vrot.slane %v3586_v30, %v7368_v25  ;;  %v3610_v16 = vrot.slane %v3505_v23, %v7368_v25 }
 0x23d   :  { %v3534_v22 = vcombine.high %v7386_v3, %v7386_v3  ;;  %v3551_v45 = vcombine.high %v3549_v11, %v3549_v11  ;;  %v3617_v49 = vrot.slane %v3603_v27, %v7368_v25  ;;  %v3620_v43 = vcombine.high %v3506_v36, %v3506_v36 }
 0x23e   :  { %v3568_v46 = vcombine.high %v3566_v56, %v3566_v56  ;;  %v3602_v7 = vcombine.high %v3600_v62, %v3600_v62  ;;  %v3618_v18 = vcombine.high %v3610_v16, %v3610_v16  ;;  %v3627_v0 = vrot.slane %v3506_v36, %v7368_v25 }
 0x23f   :  { %v3619_v2 = vcombine.high %v3617_v49, %v3617_v49  ;;  %v3634_v8 = vrot.slane %v3620_v43, %v7368_v25  ;;  %v3637_v21 = vcombine.high %v3507_v15, %v3507_v15  ;;  %v3644_v61 = vrot.slane %v3507_v15, %v7368_v25 }
 0x240   :  { %v3635_v1 = vcombine.high %v3627_v0, %v3627_v0  ;;  %v3654_v24 = vcombine.high %v3508_v58, %v3508_v58  ;;  %v3661_v4 = vrot.slane %v3508_v58, %v7368_v25  ;;  %v3671_v14 = vcombine.low %v3525_v29, %v3533_v48 }
 0x241   :  { %v3636_v5 = vcombine.high %v3634_v8, %v3634_v8  ;;  %v3651_v6 = vrot.slane %v3637_v21, %v7368_v25  ;;  %v3652_v31 = vcombine.high %v3644_v61, %v3644_v61  ;;  %v3687_v53 = vcombine.low %v3534_v22, %v3542_v10 }
 0x242   :  { %v3668_v17 = vrot.slane %v3654_v24, %v7368_v25  ;;  %v3669_v33 = vcombine.high %v3661_v4, %v3661_v4  ;;  %v3701_v12 = vrot.slane %v3550_v32, %v7368_v25  ;;  %v3703_v54 = vcombine.low %v3549_v11, %v3551_v45 }
 0x243   :  { %v3653_v38 = vcombine.high %v3651_v6, %v3651_v6  ;;  %v3694_v41 = vrot.slane %v3687_v53, %v7368_v25  ;;  %v3717_v28 = vrot.slane %v3559_v44, %v7368_v25  ;;  %v3719_v55 = vcombine.low %v3567_v52, %v3566_v56 }
 0x244   :  { %v3670_v57 = vcombine.high %v3668_v17, %v3668_v17  ;;  %v3710_v50 = vrot.slane %v3703_v54, %v7368_v25  ;;  %v3733_v26 = vrot.slane %v3568_v46, %v7368_v25  ;;  %v3767_v63 = vcombine.low %v3600_v62, %v3602_v7 }
 0x245   :  { %v3726_v47 = vrot.slane %v3719_v55, %v7368_v25  ;;  %v3781_v35 = vrot.slane %v3610_v16, %v7368_v25  ;;  %v3783_v20 = vcombine.low %v3618_v18, %v3617_v49  ;;  %v3797_v51 = vrot.slane %v3619_v2, %v7368_v25 }
 0x246   :  { %v7409_v40 = vcombine.low %v3710_v50, %v3717_v28  ;;  %v3774_v60 = vrot.slane %v3767_v63, %v7368_v25  ;;  %v3799_v9 = vcombine.low %v3627_v0, %v3635_v1  ;;  %v3813_v23 = vrot.slane %v3634_v8, %v7368_v25 }
 0x247   :  { %v3790_v36 = vrot.slane %v3783_v20, %v7368_v25  ;;  %v3815_v15 = vcombine.low %v3636_v5, %v3644_v61  ;;  %v3829_v58 = vrot.slane %v3652_v31, %v7368_v25  ;;  %v3831_v42 = vcombine.low %v3651_v6, %v3653_v38 }
 0x248   :  { %v7415_v29 = vcombine.low %v3774_v60, %v3781_v35  ;;  %v3806_v59 = vrot.slane %v3799_v9, %v7368_v25  ;;  %v3845_v10 = vrot.slane %v3661_v4, %v7368_v25  ;;  %v3847_v37 = vcombine.low %v3669_v33, %v3668_v17 }
 0x249   :  { %v7419_v44 = vcombine.low %v3790_v36, %v3797_v51  ;;  %v3822_v30 = vrot.slane %v3815_v15, %v7368_v25  ;;  %v3838_v27 = vrot.slane %v3831_v42, %v7368_v25  ;;  %v3861_v48 = vrot.slane %v3670_v57, %v7368_v25 }
 0x24a   :  { %v7424_v11 = vcombine.low %v3806_v59, %v3813_v23  ;;  %v3854_v32 = vrot.slane %v3847_v37, %v7368_v25  ;;  %v3881_v56 = vpack.c.bf16 %v7415_v29, %v7415_v29  ;;  %v3678_v52 = vrot.slane %v3671_v14, %v7368_v25 }
 0x24b   :  { %v7430_v62 = vcombine.low %v3822_v30, %v3829_v58  ;;  %v7432_v16 = vcombine.low %v3838_v27, %v3845_v10  ;;  %v3882_v22 = vpack.c.bf16 %v7419_v44, %v7419_v44  ;;  %v3685_v45 = vrot.slane %v7386_v3, %v7368_v25 }
 0x24c   :  { %v7438_v49 = vcombine.low %v3854_v32, %v3861_v48  ;;  %v3883_v43 = vpack.c.bf16 %v7424_v11, %v7424_v11  ;;  %v7443_v46 = vrot.slane %v3881_v56, %v7368_v25  ;;  %v7445_v7 = vcombine.low %v3694_v41, %v3701_v12 }
 0x24d   :  { %v3884_v18 = vpack.c.bf16 %v7430_v62, %v7430_v62  ;;  %v3885_v0 = vpack.c.bf16 %v7432_v16, %v7432_v16  ;;  %v5217_v2 = vpack.c.bf16 %v7432_v16, %v7430_v62  ;;  %v7453_v3 = vcombine.low %v3678_v52, %v3685_v45 }
 0x24e   :  { %v7456_v8 = vrot.slane %v3883_v43, %v7368_v25  ;;  %v5227_v21 = vpack.c.bf16 %v7438_v49, %v7432_v16  ;;  %v7460_v61 = vcombine.low %v3726_v47, %v3733_v26  ;;  %v3876_v4 = vpack.c.bf16 %v7445_v7, %v7445_v7 }
 0x24f   :  { %v7463_v1 = vrot.slane %v3884_v18, %v7368_v25  ;;  %v3875_v24 = vpack.c.bf16 %v7453_v3, %v7453_v3  ;;  %v7471_v14 = vsel %vm4127_vm0, %v7345_v39, 0  ;;  %v7474_v5 = vrot.slane %v3885_v0, %v7368_v25 }
 0x250   :  { %v3877_v6 = vpack.c.bf16 %v7409_v40, %v7409_v40  ;;  %v3878_v31 = vpack.c.bf16 %v7460_v61, %v7460_v61  ;;  %v7482_v53 = vcombine.high %v7443_v46, %v7443_v46  ;;  %v7488_v33 = vrot.slane %v3876_v4, %v7368_v25 }
 0x251   :  { %v7485_v17 = vrot.slane %v3875_v24, %v7368_v25  ;;  %v7491_v39 = vrot.slane %v3882_v22, %v7368_v25  ;;  %v7495_v12 = vcombine.high %v7456_v8, %v7456_v8  ;;  %v7507_v41 = vcombine.high %v7463_v1, %v7463_v1 }
 0x252   :  { %v7498_v54 = vrot.slane %v3877_v6, %v7368_v25  ;;  %v7501_v38 = vrot.slane %v3878_v31, %v7368_v25  ;;  %v4032_v28 = vshrl.u32 %v7443_v46, 16  ;;  %v7516_v57 = vcombine.high %v7488_v33, %v7488_v33 }
 0x253   :  { %v7512_v55 = vcombine.high %v7485_v17, %v7485_v17  ;;  %v3976_v50 = vshrl.u32 %v7485_v17, 16  ;;  %v3979_v26 = vshll.u32 %v7485_v17, 16  ;;  %v3990_v35 = vshrl.u32 %v7488_v33, 16 }
 0x254   :  { %v7522_v63 = vcombine.high %v7498_v54, %v7498_v54  ;;  %v7526_v47 = vcombine.high %v7501_v38, %v7501_v38  ;;  %v3993_v20 = vshll.u32 %v7488_v33, 16  ;;  %v3999_v36 = vshll.u32 %v7516_v57, 16 }
 0x255   :  { %v3978_v60 = vrot.slane %v3976_v50, 6  ;;  %v3981_v9 = vrot.slane %v3979_v26, 7  ;;  %v3985_v23 = vshll.u32 %v7512_v55, 16  ;;  %v3992_v15 = vrot.slane %v3990_v35, 6 }
 0x256   :  { %v3995_v58 = vrot.slane %v3993_v20, 7  ;;  %v4004_v42 = vshrl.u32 %v7498_v54, 16  ;;  %v4007_v59 = vshll.u32 %v7498_v54, 16  ;;  %v4001_v30 = vrot.slane %v3999_v36, 7 }
 0x257   :  { %v3982_v10 = vor.u32 %v3981_v9, %v3978_v60  ;;  %v3987_v37 = vrot.slane %v3985_v23, 7  ;;  %v4013_v27 = vshll.u32 %v7522_v63, 16  ;;  %v4018_v22 = vshrl.u32 %v7501_v38, 16 }
 0x258   :  { %v3996_v32 = vor.u32 %v3995_v58, %v3992_v15  ;;  %v4006_v56 = vrot.slane %v4004_v42, 6  ;;  %v4009_v52 = vrot.slane %v4007_v59, 7  ;;  %v4021_v18 = vshll.u32 %v7501_v38, 16 }
 0x259   :  { %v3983_v45 = vrot.slane %v3982_v10, 2  ;;  %v4015_v43 = vrot.slane %v4013_v27, 7  ;;  %v4027_v0 = vshll.u32 %v7526_v47, 16  ;;  %v4020_v6 = vrot.slane %v4018_v22, 6 }
 0x25a   :  { %v3997_v24 = vrot.slane %v3996_v32, 2  ;;  %v4010_v4 = vor.u32 %v4009_v52, %v4006_v56  ;;  %v7552_v31 = vcombine.high %v7491_v39, %v7491_v39  ;;  %v4023_v26 = vrot.slane %v4021_v18, 7 }
 0x25b   :  { %v3988_v50 = vsel %vm7543_vm12, %v3983_v45, %v3987_v37  ;;  %v4029_v35 = vrot.slane %v4027_v0, 7  ;;  %v4034_v20 = vrot.slane %v4032_v28, 6  ;;  %v4035_v9 = vshll.u32 %v7443_v46, 16 }
 0x25c   :  { %v7558_v51 = vsel %vm7543_vm12, %v3997_v24, %v4001_v30  ;;  %v4011_v60 = vrot.slane %v4010_v4, 2  ;;  %v4041_v23 = vshll.u32 %v7482_v53, 16  ;;  %v4024_v36 = vor.u32 %v4023_v26, %v4020_v6 }
 0x25d   :  { %v4087_v15 = vcombine.low %v3988_v50, %v7558_v51  ;;  %v4046_v58 = vshrl.u32 %v7491_v39, 16  ;;  %v4049_v42 = vshll.u32 %v7491_v39, 16  ;;  %v4037_v59 = vrot.slane %v4035_v9, 7 }
 0x25e   :  { %v7567_v28 = vsel %vm7543_vm12, %v4011_v60, %v4015_v43  ;;  %v4043_v10 = vrot.slane %v4041_v23, 7  ;;  %v4055_v37 = vshll.u32 %v7552_v31, 16  ;;  %v4025_v30 = vrot.slane %v4024_v36, 2 }
 0x25f   :  { %v4095_v27 = vrot.slane %v4087_v15, %v7368_v25  ;;  %v4048_v32 = vrot.slane %v4046_v58, 6  ;;  %v4051_v56 = vrot.slane %v4049_v42, 7  ;;  %v4038_v52 = vor.u32 %v4037_v59, %v4034_v20 }
 0x260   :  { %v4057_v22 = vrot.slane %v4055_v37, 7  ;;  %v4060_v45 = vshrl.u32 %v7456_v8, 16  ;;  %v4063_v18 = vshll.u32 %v7456_v8, 16  ;;  %v7575_v0 = vsel %vm7543_vm12, %v4025_v30, %v4029_v35 }
 0x261   :  { %v4052_v43 = vor.u32 %v4051_v56, %v4048_v32  ;;  %v4069_v24 = vshll.u32 %v7495_v12, 16  ;;  %v4074_v4 = vshrl.u32 %v7463_v1, 16  ;;  %v4088_v6 = vcombine.low %v7567_v28, %v7575_v0 }
 0x262   :  { %v4039_v50 = vrot.slane %v4038_v52, 2  ;;  %v4062_v26 = vrot.slane %v4060_v45, 6  ;;  %v4065_v20 = vrot.slane %v4063_v18, 7  ;;  %v4077_v35 = vshll.u32 %v7463_v1, 16 }
 0x263   :  { %v4053_v60 = vrot.slane %v4052_v43, 2  ;;  %v4071_v9 = vrot.slane %v4069_v24, 7  ;;  %v4076_v23 = vrot.slane %v4074_v4, 6  ;;  %v7585_v36 = vrot.slane %v4088_v6, %v7368_v25 }
 0x264   :  { %v4044_v15 = vsel %vm7543_vm12, %v4039_v50, %v4043_v10  ;;  %v4066_v58 = vor.u32 %v4065_v20, %v4062_v26  ;;  %v4083_v42 = vshll.u32 %v7507_v41, 16  ;;  %v4079_v37 = vrot.slane %v4077_v35, 7 }
 0x265   :  { %v7592_v59 = vsel %vm7543_vm12, %v4053_v60, %v4057_v22  ;;  %v5198_v30 = vpack.c.bf16 %v7445_v7, %v7453_v3  ;;  %v5199_v32 = vpack.c.bf16 %v7460_v61, %v7409_v40  ;;  %v4103_v56 = vcombine.low %v4095_v27, %v7585_v36 }
 0x266   :  { %v4067_v52 = vrot.slane %v4066_v58, 2  ;;  %v4085_v10 = vrot.slane %v4083_v42, 7  ;;  %v4104_v45 = vcombine.low %v4044_v15, %v7592_v59  ;;  %v4080_v18 = vor.u32 %v4079_v37, %v4076_v23 }
 0x267   :  { %v4188_v43 = vrot.slane %v5198_v30, %v7368_v25  ;;  %v7603_v22 = vrot.slane %v5199_v32, %v7368_v25  ;;  %v5200_v3 = vpack.c.bf16 %v7419_v44, %v7415_v29  ;;  %5517 = vmatprep.mubr.msk.bf16.mxu1 %vm3422_vm1, %v4103_v56  ;;  %v5201_v4 = vpack.c.bf16 %v7430_v62, %v7424_v11 }
 0x268   :  { %v7610_v24 = vsel %vm7543_vm12, %v4067_v52, %v4071_v9  ;;  %v4112_v27 = vrot.slane %v4104_v45, %v7368_v25  ;;  %v5204_v50 = vrot.slane %v7485_v17, 9  ;;  %v4081_v26 = vrot.slane %v4080_v18, 2 }
 0x269   :  { %v4196_v29 = vcombine.low %v4188_v43, %v7603_v22  ;;  %v7623_v20 = vrot.slane %v5200_v3, %v7368_v25  ;;  %v4281_v60 = vrot.slane %v7512_v55, 7  ;;  %v7627_v9 = vrot.slane %v5201_v4, %v7368_v25  ;;  %v3889_v4 = vld [vmem:[%s7913_s2 + $0x8] sm:$0xf] }
 0x26a   :  { %v5205_v23 = vrot.slane %v7488_v33, 9  ;;  %v4285_v35 = vrot.slane %v7516_v57, 7  ;;  %v5206_v15 = vrot.slane %v7498_v54, 9  ;;  %v7634_v17 = vsel %vm7543_vm12, %v4081_v26, %v4085_v10 }
 0x26b   :  { %v4282_v58 = vsel %vm7616_vm3, %v5204_v50, %v4281_v60  ;;  %v4289_v42 = vrot.slane %v7522_v63, 7  ;;  %v5207_v55 = vrot.slane %v7501_v38, 9  ;;  %v4105_v37 = vcombine.low %v7610_v24, %v7634_v17 }
 0x26c   :  { %v4213_v33 = vcombine.low %v7623_v20, %v7627_v9  ;;  %v7646_v54 = vsel %vm7616_vm3, %v5205_v23, %v4285_v35  ;;  %v4293_v57 = vrot.slane %v7526_v47, 7  ;;  %v5208_v38 = vrot.slane %v7443_v46, 9 }
 0x26d   :  { %v7651_v30 = vsel %vm7616_vm3, %v5206_v15, %v4289_v42  ;;  %v4311_v63 = vcombine.low %v4282_v58, %v7646_v54  ;;  %v4297_v32 = vrot.slane %v7482_v53, 7  ;;  %v7657_v56 = vrot.slane %v4105_v37, %v7368_v25 }
 0x26e   :  { %v7661_v52 = vsel %vm7616_vm3, %v5207_v55, %v4293_v57  ;;  %v5209_v10 = vrot.slane %v7491_v39, 9  ;;  %v4301_v47 = vrot.slane %v7552_v31, 7  ;;  %v5210_v53 = vrot.slane %v7456_v8, 9 }
 0x26f   :  { %v4312_v45 = vcombine.low %v7651_v30, %v7661_v52  ;;  %v7668_v18 = vrot.slane %v4311_v63, %v7368_v25  ;;  %v4298_v46 = vsel %vm7616_vm3, %v5208_v38, %v4297_v32  ;;  %v4120_v43 = vcombine.low %v4112_v27, %v7657_v56 }
 0x270   :  { %v4302_v3 = vsel %vm7616_vm3, %v5209_v10, %v4301_v47  ;;  %v4305_v39 = vrot.slane %v7495_v12, 7  ;;  %v5211_v31 = vrot.slane %v7463_v1, 9  ;;  %v4309_v26 = vrot.slane %v7507_v41, 7 }
 0x271   :  { %v7682_v50 = vrot.slane %v4312_v45, %v7368_v25  ;;  %v4328_v60 = vcombine.low %v4298_v46, %v4302_v3  ;;  %v3494_v8 = vmul.f32 %v7365_v19, %v7352_v13  ;;  %v3886_v27 = vpack.c.bf16 %v7438_v49, %v7438_v49  ;;  %5518 = vmatmul.mubr.msk.bf16.vlgmr.msra.gmra.mrb[20].mxu1 %vm3422_vm1, %v4120_v43 }
 0x272   :  { %v5214_v1 = vpack.c.bf16 %v7409_v40, %v7445_v7  ;;  %v5216_v12 = vpack.c.bf16 %v7424_v11, %v7419_v44  ;;  %v7698_v41 = vrot.slane %v5217_v2, %v7368_v25  ;;  %5522 = vmatpush3.bf16.msra.mxu1 %v7471_v14  ;;  %5523 = vmatprep.mubr.msk.bf16.mxu1 %vm3422_vm1, %v4196_v29  ;;  %v4536_v35 = vshrl.u32 %v7474_v5, 16 }
 0x273   :  { %v4327_v13 = vcombine.low %v7668_v18, %v7682_v50  ;;  %v4306_v19 = vsel %vm7616_vm3, %v5210_v53, %v4305_v39  ;;  %v4310_v40 = vsel %vm7616_vm3, %v5211_v31, %v4309_v26  ;;  %v3503_v44 = vmax.f32 %v3494_v8, 0.0  ;;  %5754 = vmatprep.subr.msk.bf16.mxu1 %vm4127_vm0, %v3889_v4 }
 0x274   :  { %v4329_v11 = vcombine.low %v4306_v19, %v4310_v40  ;;  %v7710_v62 = vrot.slane %v4328_v60, %v7368_v25  ;;  %v7713_v7 = vrot.slane %v5216_v12, %v7368_v25  ;;  %v4549_v2 = vcombine.low %v7558_v51, %v7567_v28 }
 0x275   :  { %v3569_v14 = vcombine.high %v3503_v44, %v3503_v44  ;;  %v3576_v29 = vrot.slane %v3503_v44, %v7368_v25  ;;  %v4520_v23 = vcombine.high %v7474_v5, %v7474_v5  ;;  %v4352_v15 = vsel %vm4127_vm0, %v3889_v4, 0 }
 0x276   :  { %v7723_v58 = vrot.slane %v4329_v11, %v7368_v25  ;;  %v4442_v42 = vcombine.low %v7713_v7, %v7698_v41  ;;  %v4539_v55 = vshll.u32 %v7474_v5, 16  ;;  %v4538_v63 = vrot.slane %v4536_v35, 6  ;;  %v3894_v41 = vld [vmem:[%s7913_s2 + $0x1c] sm:$0xf] }
 0x277   :  { %v3583_v37 = vrot.slane %v3569_v14, %v7368_v25  ;;  %v3584_v57 = vcombine.high %v3576_v29, %v3576_v29  ;;  %v4545_v38 = vshll.u32 %v4520_v23, 16  ;;  %v4566_v47 = vcombine.low %v7592_v59, %v7610_v24 }
 0x278   :  { %v4344_v32 = vcombine.low %v7710_v62, %v7723_v58  ;;  %v4541_v10 = vrot.slane %v4539_v55, 7  ;;  %v4653_v45 = vcombine.low %v7646_v54, %v7651_v30  ;;  %v7736_v18 = vrot.slane %v3886_v27, %v7368_v25 }
 0x279   :  { %v3735_v46 = vcombine.low %v3576_v29, %v3584_v57  ;;  %v3749_v53 = vrot.slane %v3583_v37, %v7368_v25  ;;  %v7740_v43 = vrot.slane %v5214_v1, %v7368_v25  ;;  %v4547_v31 = vrot.slane %v4545_v38, 7 }
 0x27a   :  { %v4542_v39 = vor.u32 %v4541_v10, %v4538_v63  ;;  %v5223_v4 = vrot.slane %v7474_v5, 9  ;;  %v4651_v26 = vrot.slane %v4520_v23, 7  ;;  %v4670_v59 = vcombine.low %v4302_v3, %v4306_v19  ;;  %v3890_v3 = vld [vmem:[%s7913_s2 + $0xc] sm:$0xf] }
 0x27b   :  { %v3742_v60 = vrot.slane %v3735_v46, %v7368_v25  ;;  %v3585_v24 = vcombine.high %v3583_v37, %v3583_v37  ;;  %v3593_v8 = vrot.slane %v7378_v34, %v7368_v25  ;;  %v7747_v12 = vrot.slane %v4566_v47, %v7368_v25 }
 0x27c   :  { %v4543_v27 = vrot.slane %v4542_v39, 2  ;;  %v7751_v1 = vsel %vm7616_vm3, %v5223_v4, %v4651_v26  ;;  %v7757_v5 = vrot.slane %v5227_v21, %v7368_v25  ;;  %v7764_v44 = vrot.slane %v4670_v59, %v7368_v25 }
 0x27d   :  { %v3750_v19 = vcombine.low %v3742_v60, %v3749_v53  ;;  %v4671_v34 = vcombine.low %v4310_v40, %v7751_v1  ;;  %v3601_v11 = vcombine.high %v3593_v8, %v3593_v8  ;;  %5524 = vmatmul.mubr.msk.bf16.vlgmr.msra.gmra.mrb[20].mxu1 %vm3422_vm1, %v4213_v33  ;;  %v3751_v49 = vcombine.low %v3585_v24, %v3593_v8 }
 0x27e   :  { %v7772_v16 = vsel %vm7543_vm12, %v4543_v27, %v4547_v31  ;;  %v4768_v21 = vcombine.low %v7627_v9, %v7757_v5  ;;  %v7778_v40 = vcombine.high %v7736_v18, %v7736_v18  ;;  %5528 = vmatpush3.bf16.msra.mxu1 %v4352_v15  ;;  %5529 = vmatprep.mubr.msk.bf16.mxu1 %vm3422_vm1, %v4327_v13  ;;  %v4862_v29 = vshrl.u32 %v7736_v18, 16 }
 0x27f   :  { %v3879_v14 = vpack.c.bf16 %v3750_v19, %v3750_v19  ;;  %v5215_v20 = vpack.c.bf16 %v3750_v19, %v7460_v61  ;;  %v4567_v33 = vcombine.low %v7634_v17, %v7772_v16  ;;  %5755 = vmatprep.subr.msk.bf16.mxu1 %vm4127_vm0, %v3890_v3  ;;  %v7787_v23 = vrot.slane %v4671_v34, %v7368_v25 }
 0x280   :  { %v3758_v35 = vrot.slane %v3751_v49, %v7368_v25  ;;  %v3765_v55 = vrot.slane %v3601_v11, %v7368_v25  ;;  %v4865_v15 = vshll.u32 %v7736_v18, 16  ;;  %v4864_v17 = vrot.slane %v4862_v29, 6 }
 0x281   :  { %v4424_v13 = vrot.slane %v5215_v20, %v7368_v25  ;;  %v4511_v61 = vrot.slane %v3879_v14, %v7368_v25  ;;  %v7795_v37 = vrot.slane %v4567_v33, %v7368_v25  ;;  %v4686_v57 = vcombine.low %v7764_v44, %v7787_v23 }
 0x282   :  { %v3766_v63 = vcombine.low %v3758_v35, %v3765_v55  ;;  %v4867_v38 = vrot.slane %v4865_v15, 7  ;;  %v4871_v10 = vshll.u32 %v7778_v40, 16  ;;  %v4450_v34 = vsel %vm4127_vm0, %v3890_v3, 0  ;;  %v3891_v15 = vld [vmem:[%s7913_s2 + $0x10] sm:$0xf] }
 0x283   :  { %v4425_v47 = vcombine.low %v7740_v43, %v4424_v13  ;;  %v4512_v46 = vcombine.high %v4511_v61, %v4511_v61  ;;  %v4522_v53 = vshrl.u32 %v4511_v61, 16  ;;  %v4525_v39 = vshll.u32 %v4511_v61, 16 }
 0x284   :  { %v4582_v31 = vcombine.low %v7747_v12, %v7795_v37  ;;  %v5222_v4 = vrot.slane %v4511_v61, 9  ;;  %v3880_v26 = vpack.c.bf16 %v3766_v63, %v3766_v63  ;;  %v5226_v60 = vpack.c.bf16 %v3766_v63, %v3750_v19 }
 0x285   :  { %v4524_v59 = vrot.slane %v4522_v53, 6  ;;  %v4527_v24 = vrot.slane %v4525_v39, 7  ;;  %v4531_v8 = vshll.u32 %v4512_v46, 16  ;;  %v4647_v27 = vrot.slane %v4512_v46, 7 }
 0x286   :  { %v7805_v11 = vrot.slane %v5226_v60, %v7368_v25  ;;  %v4837_v43 = vrot.slane %v3880_v26, %v7368_v25  ;;  %v4868_v49 = vor.u32 %v4867_v38, %v4864_v17  ;;  %v4661_v19 = vrot.slane %v4653_v45, %v7368_v25 }
 0x287   :  { %v4528_v14 = vor.u32 %v4527_v24, %v4524_v59  ;;  %v4648_v20 = vsel %vm7616_vm3, %v5222_v4, %v4647_v27  ;;  %v4873_v33 = vrot.slane %v4871_v10, 7  ;;  %v4533_v61 = vrot.slane %v4531_v8, 7 }
 0x288   :  { %v4654_v29 = vcombine.low %v7661_v52, %v4648_v20  ;;  %v4759_v3 = vcombine.low %v7603_v22, %v7805_v11  ;;  %v4838_v35 = vcombine.high %v4837_v43, %v4837_v43  ;;  %v4848_v55 = vshrl.u32 %v4837_v43, 16 }
 0x289   :  { %v4529_v13 = vrot.slane %v4528_v14, 2  ;;  %v4851_v17 = vshll.u32 %v4837_v43, 16  ;;  %v4869_v63 = vrot.slane %v4868_v49, 2  ;;  %5530 = vmatmul.mubr.msk.bf16.vlgmr.msra.gmra.mrb[20].mxu1 %vm3422_vm1, %v4344_v32  ;;  %v5232_v52 = vrot.slane %v4837_v43, 9 }
 0x28a   :  { %v4668_v54 = vrot.slane %v4654_v29, %v7368_v25  ;;  %v4850_v30 = vrot.slane %v4848_v55, 6  ;;  %v4957_v22 = vrot.slane %v4838_v35, 7  ;;  %5534 = vmatpush3.bf16.msra.mxu1 %v4450_v34  ;;  %5535 = vmatprep.mubr.msk.bf16.mxu1 %vm3422_vm1, %v4425_v47  ;;  %v4857_v10 = vshll.u32 %v4838_v35, 16 }
 0x28b   :  { %v4534_v45 = vsel %vm7543_vm12, %v4529_v13, %v4533_v61  ;;  %v4853_v38 = vrot.slane %v4851_v17, 7  ;;  %v4874_v46 = vsel %vm7543_vm12, %v4869_v63, %v4873_v33  ;;  %5756 = vmatprep.subr.msk.bf16.mxu1 %vm4127_vm0, %v3891_v15  ;;  %v4557_v32 = vrot.slane %v4549_v2, %v7368_v25 }
 0x28c   :  { %v4550_v62 = vcombine.low %v7575_v0, %v4534_v45  ;;  %v4669_v53 = vcombine.low %v4661_v19, %v4668_v54  ;;  %v4884_v47 = vcombine.low %v7772_v16, %v4874_v46  ;;  %v4958_v4 = vsel %vm7616_vm3, %v5232_v52, %v4957_v22 }
 0x28d   :  { %v4854_v39 = vor.u32 %v4853_v38, %v4850_v30  ;;  %v5233_v26 = vrot.slane %v7736_v18, 9  ;;  %v4961_v60 = vrot.slane %v7778_v40, 7  ;;  %v4963_v24 = vcombine.low %v4648_v20, %v4958_v4 }
 0x28e   :  { %v4564_v59 = vrot.slane %v4550_v62, %v7368_v25  ;;  %v4891_v0 = vrot.slane %v4884_v47, %v7368_v25  ;;  %v4859_v27 = vrot.slane %v4857_v10, 7  ;;  %v4590_v49 = vsel %vm4127_vm0, %v3891_v15, 0 }
 0x28f   :  { %v4855_v8 = vrot.slane %v4854_v39, 2  ;;  %v4962_v51 = vsel %vm7616_vm3, %v5233_v26, %v4961_v60  ;;  %v4970_v16 = vrot.slane %v4963_v24, %v7368_v25  ;;  %v4900_v7 = vsel %vm4127_vm0, %v3894_v41, 0 }
 0x290   :  { %v4565_v28 = vcombine.low %v4557_v32, %v4564_v59  ;;  %v4892_v2 = vcombine.low %v7657_v56, %v4891_v0  ;;  %v4972_v34 = vcombine.low %v7751_v1, %v4962_v51  ;;  %v3892_v56 = vld [vmem:[%s7913_s2 + $0x14] sm:$0xf] }
 0x291   :  { %v4860_v18 = vsel %vm7543_vm12, %v4855_v8, %v4859_v27  ;;  %v4971_v11 = vcombine.low %v7682_v50, %v4970_v16  ;;  %v3893_v50 = vld [vmem:[%s7913_s2 + $0x18] sm:$0xf] }
 0x292   :  { %v4875_v40 = vcombine.low %v4534_v45, %v4860_v18  ;;  %v4979_v43 = vrot.slane %v4972_v34, %v7368_v25 }
 0x294   :  { %v4882_v6 = vrot.slane %v4875_v40, %v7368_v25  ;;  %v4980_v14 = vcombine.low %v7723_v58, %v4979_v43  ;;  %v4694_v25 = vsel %vm4127_vm0, %v3892_v56, 0  ;;  %v3895_v58 = vld [vmem:[%s7913_s2 + $0x20] sm:$0xf] }
 0x295   :  { %5536 = vmatmul.mubr.msk.bf16.vlgmr.msra.gmra.mrb[20].mxu1 %vm3422_vm1, %v4442_v42  ;;  %v4988_v42 = vsel %vm4127_vm0, %v3895_v58, 0 }
 0x296   :  { %v4883_v48 = vcombine.low %v7585_v36, %v4882_v6  ;;  %5540 = vmatpush3.bf16.msra.mxu1 %v4590_v49  ;;  %5541 = vmatprep.mubr.msk.bf16.mxu1 %vm3422_vm1, %v4565_v28  ;;  %v4776_v36 = vsel %vm4127_vm0, %v3893_v50, 0 }
 0x297   :  { %5757 = vmatprep.subr.msk.bf16.mxu1 %vm4127_vm0, %v3892_v56 }
 0x2a1   :  { %5542 = vmatmul.mubr.msk.bf16.vlgmr.msra.gmra.mrb[20].mxu1 %vm3422_vm1, %v4582_v31 }
 0x2a2   :  { %5546 = vmatpush3.bf16.msra.mxu1 %v4694_v25  ;;  %5547 = vmatprep.mubr.msk.bf16.mxu1 %vm3422_vm1, %v4669_v53 }
 0x2a3   :  { %5758 = vmatprep.subr.msk.bf16.mxu1 %vm4127_vm0, %v3893_v50 }
 0x2ad   :  { %5548 = vmatmul.mubr.msk.bf16.vlgmr.msra.gmra.mrb[20].mxu1 %vm3422_vm1, %v4686_v57 }
 0x2ae   :  { %5552 = vmatpush3.bf16.msra.mxu1 %v4776_v36  ;;  %5553 = vmatprep.mubr.msk.bf16.mxu1 %vm3422_vm1, %v4759_v3 }
 0x2af   :  { %5759 = vmatprep.subr.msk.bf16.mxu1 %vm4127_vm0, %v3894_v41 }
 0x2b9   :  { %5554 = vmatmul.mubr.msk.bf16.vlgmr.msra.gmra.mrb[20].mxu1 %vm3422_vm1, %v4768_v21 }
 0x2ba   :  { %5558 = vmatpush3.bf16.msra.mxu1 %v4900_v7  ;;  %5559 = vmatprep.mubr.msk.bf16.mxu1 %vm3422_vm1, %v4883_v48 }
 0x2bb   :  { %5760 = vmatprep.subr.msk.bf16.mxu1 %vm4127_vm0, %v3895_v58 }
 0x2c5   :  { %5560 = vmatmul.mubr.msk.bf16.vlgmr.msra.gmra.mrb[20].mxu1 %vm3422_vm1, %v4892_v2 }
 0x2c6   :  { %5564 = vmatpush3.bf16.msra.mxu1 %v4988_v42  ;;  %5565 = vmatprep.mubr.msk.bf16.mxu1 %vm3422_vm1, %v4971_v11 }
 0x2d1   :  { %5566 = vmatmul.mubr.msk.bf16.vlgmr.msra.gmra.mrb[20].mxu1 %vm3422_vm1, %v4980_v14 }
 0x3a4   :  { %v5567_v12 = vpop.f32.mrb[20].mxu1 }
 0x3a5   :  { %v5024_v1 = vpop.f32.mrb[21].mxu1 }
 0x3a6   :  { %v5568_v44 = vpop.f32.mrb[22].mxu1 }
 0x3a7   :  { %v5027_v9 = vpop.f32.mrb[23].mxu1 }
 0x3a8   :  { %v5043_v5 = vadd.f32 %v5027_v9, %v5024_v1 }
 0x3aa   :  { %v5044_v21 = vadd.f32 %v5567_v12, %v5043_v5 }
 0x3ac   :  { %v5045_v23 = vadd.f32 %v5568_v44, %v5044_v21 }
 0x3ae   :  { %v5046_v37 = vrot.slane %v5045_v23, 4 }
 0x3b0   :  { %v5047_v57 = vadd.f32 %v5046_v37, %v5045_v23 }
 0x3b2   :  { %v5048_v31 = vrot.slane %v5047_v57, 2 }
 0x3b4   :  { %v5049_v20 = vadd.f32 %v5048_v31, %v5047_v57 }
 0x3b6   :  { %v5050_v19 = vrot.slane %v5049_v20, 1 }
 0x3b8   :  { %v5051_v33 = vadd.f32 %v5050_v19, %v5049_v20 }
 0x3ba   :  { %v5052_v29 = vmul.f32 0.03125, %v5051_v33 }
 0x3bc   :  { %v5053_v3 = vsub.f32 %v5024_v1, %v5052_v29  ;;  %v5054_v35 = vsub.f32 %v5027_v9, %v5052_v29  ;;  %v5055_v55 = vsub.f32 %v5567_v12, %v5052_v29  ;;  %v5056_v15 = vsub.f32 %v5568_v44, %v5052_v29 }
 0x3be   :  { %v5057_v13 = vmul.f32 %v5053_v3, %v5053_v3  ;;  %v5058_v61 = vmul.f32 %v5054_v35, %v5054_v35  ;;  %v5059_v17 = vmul.f32 %v5055_v55, %v5055_v55  ;;  %v5060_v54 = vmul.f32 %v5056_v15, %v5056_v15 }
 0x3c0   :  { %v5061_v63 = vadd.f32 %v5058_v61, %v5057_v13 }
 0x3c2   :  { %v5062_v30 = vadd.f32 %v5061_v63, %v5059_v17 }
 0x3c4   :  { %v5063_v52 = vadd.f32 %v5062_v30, %v5060_v54 }
 0x3c6   :  { %v5064_v22 = vrot.slane %v5063_v52, 4 }
 0x3c8   :  { %v5065_v45 = vadd.f32 %v5064_v22, %v5063_v52 }
 0x3ca   :  { %v5066_v38 = vrot.slane %v5065_v45, 2 }
 0x3cc   :  { %v5067_v10 = vadd.f32 %v5066_v38, %v5065_v45 }
 0x3ce   :  { %v5068_v46 = vrot.slane %v5067_v10, 1 }
 0x3d0   :  { %v5069_v62 = vadd.f32 %v5068_v46, %v5067_v10 }
 0x3d2   :  { %v5070_v32 = vmul.f32 0.03125, %v5069_v62 }
 0x3d4   :  { %v5071_v53 = vadd.f32 1e-05, %v5070_v32 }
 0x3d6   :  { %5767 = vrsqrt.f32 %v5071_v53 }
 0x3e0   :  { %v5768_v47 = vpop.eup %5767 }
 0x3e1   :  { %v5073_v39 = vmul.f32 %v5768_v47, %v5053_v3  ;;  %v5074_v4 = vmul.f32 %v5768_v47, %v5054_v35  ;;  %v5075_v26 = vmul.f32 %v5768_v47, %v5055_v55  ;;  %v5076_v60 = vmul.f32 %v5768_v47, %v5056_v15 }
 0x3e3   :  { %v5077_v59 = vmax.f32 %v5073_v39, 0.0  ;;  %v5078_v0 = vmax.f32 %v5074_v4, 0.0  ;;  %v5079_v24 = vmax.f32 %v5075_v26, 0.0  ;;  %v5080_v8 = vmax.f32 %v5076_v60, 0.0 }
 0x3e5   :  { %5081 = vst [vmem:[%s7914_s3] sm:$0xff] %v5077_v59  ;;  %5082 = vst [vmem:[%s7914_s3 + $0x8] sm:$0xff] %v5078_v0 }
 0x3e6   :  { %5083 = vst [vmem:[%s7914_s3 + $0x10] sm:$0xff] %v5079_v24  ;;  %5084 = vst [vmem:[%s7914_s3 + $0x18] sm:$0xff] %v5080_v8 }

</bundles_post_ra>
